<compile_context>
chip_gen: v7x
topology: tpu7x:2x2x1
jax: 0.10.0
libtpu: 0.0.40
codegen_flags: <defaults>
</compile_context>

<pallas_src>
import jax
import jax.numpy as jnp
from jax import lax
from jax.experimental import pallas as pl
from jax.experimental.pallas import tpu as pltpu


def lstm_fc_kernel(emb_ref, wih_ref, whh_ref, b_ref, fcw_ref, fcb_ref,
                   out_ref, xp_scr, h_scr, c_scr):
    """Gate-fused single-layer LSTM recurrence + final linear layer.

    emb_ref : (T*Bp, E)  bf16  time-major embedded tokens, batch padded to Bp
    wih_ref : (E, 4H)    bf16  input->gate weights, columns ordered [i|f|g|o]
    whh_ref : (H, 4H)    bf16  hidden->gate weights, columns ordered [i|f|g|o]
    b_ref   : (1, 4H)    f32   combined bias (b_ih + b_hh)
    fcw_ref : (H, Cp)    bf16  classifier weight (transposed, lane-padded)
    fcb_ref : (1, Cp)    f32   classifier bias (lane-padded)
    out_ref : (Bp, Cp)   f32   logits (padded)
    xp_scr  : (T*Bp,4H)  f32   precomputed input projection (+bias)
    h_scr   : (Bp, H)    f32   hidden state
    c_scr   : (Bp, H)    f32   cell state
    """
    Bp, H = h_scr.shape
    T = emb_ref.shape[0] // Bp

    # 1) Input projection hoisted out of the recurrence: one lane-dense matmul
    #    covering every timestep; bias folded in once (no per-step broadcast).
    xp_scr[...] = (
        jnp.dot(emb_ref[...], wih_ref[...], preferred_element_type=jnp.float32)
        + b_ref[...])

    h_scr[...] = jnp.zeros_like(h_scr)
    c_scr[...] = jnp.zeros_like(c_scr)

    # 2) Serial recurrence: one (Bp,H)@(H,4H) matmul + elementwise gates/step.
    def step(t, carry):
        row = pl.multiple_of(t * Bp, Bp)
        gates = xp_scr[pl.ds(row, Bp), :] + jnp.dot(
            h_scr[...].astype(jnp.bfloat16), whh_ref[...],
            preferred_element_type=jnp.float32)                  # (Bp, 4H)
        i_g = jax.nn.sigmoid(gates[:, 0 * H:1 * H])
        f_g = jax.nn.sigmoid(gates[:, 1 * H:2 * H])
        g_g = jnp.tanh(gates[:, 2 * H:3 * H])
        o_g = jax.nn.sigmoid(gates[:, 3 * H:4 * H])
        c_new = f_g * c_scr[...] + i_g * g_g
        c_scr[...] = c_new
        h_scr[...] = o_g * jnp.tanh(c_new)
        return carry

    lax.fori_loop(0, T, step, 0, unroll=True)

    # 3) fc(h_last) — lane-padded output, unmasked stores.
    out_ref[...] = (
        jnp.dot(h_scr[...].astype(jnp.bfloat16), fcw_ref[...],
                preferred_element_type=jnp.float32)
        + fcb_ref[...])


def _round_up(x, m):
    return (x + m - 1) // m * m


def sentiment_rnn_forward(tokens, embedding_matrix, w_ih, w_hh, b_ih, b_hh,
                          fc_w, fc_b):
    """Reproduces SentimentRNN.forward (LSTM, unidirectional, no attention).

    tokens           : (B, T) int32
    embedding_matrix : (V, E)
    w_ih             : (4H, E)   torch weight_ih_l0, gate order (i, f, g, o)
    w_hh             : (4H, H)   torch weight_hh_l0
    b_ih, b_hh       : (4H,)
    fc_w             : (C, H)    torch fc.weight
    fc_b             : (C,)
    Returns (logits (B, C), None)
    """
    B, T = tokens.shape
    E = embedding_matrix.shape[1]
    H = w_hh.shape[1]
    C = fc_w.shape[0]

    Bp = _round_up(B, 8)      # sublane-pad batch
    Cp = _round_up(C, 128)    # lane-pad classifier output

    # Embedding gather directly in time-major order (gathers into (T,B,E),
    # avoiding a separate (B,T,E)->(T,B,E) transpose copy of the big slab).
    # TODO(synk): at production vocab/seq sizes, stream time chunks and gather
    # embedding rows in-kernel via PrefetchScalarGridSpec / manual DMA instead
    # of materializing the whole embedded sequence in HBM + VMEM.
    emb_t = embedding_matrix[tokens.T].astype(jnp.bfloat16)      # (T, B, E)
    emb_t = jnp.pad(emb_t, ((0, 0), (0, Bp - B), (0, 0)))        # (T, Bp, E)
    emb2d = emb_t.reshape(T * Bp, E)

    # Gate-fused, transposed weights; lane blocks ordered [i|f|g|o] as in torch.
    wih_t = w_ih.T.astype(jnp.bfloat16)                          # (E, 4H)
    whh_t = w_hh.T.astype(jnp.bfloat16)                          # (H, 4H)
    bias = (b_ih + b_hh).astype(jnp.float32).reshape(1, 4 * H)   # (1, 4H)

    fcw_t = jnp.zeros((H, Cp), jnp.bfloat16).at[:, :C].set(
        fc_w.T.astype(jnp.bfloat16))                             # (H, Cp)
    fcb = jnp.zeros((1, Cp), jnp.float32).at[:, :C].set(
        fc_b.astype(jnp.float32))                                # (1, Cp)

    vmem = pl.BlockSpec(memory_space=pltpu.MemorySpace.VMEM)

    logits_p = pl.pallas_call(
        lstm_fc_kernel,
        out_shape=jax.ShapeDtypeStruct((Bp, Cp), jnp.float32),
        in_specs=[vmem] * 6,
        out_specs=vmem,
        scratch_shapes=[
            pltpu.VMEM((T * Bp, 4 * H), jnp.float32),   # hoisted x-projection
            pltpu.VMEM((Bp, H), jnp.float32),           # h state
            pltpu.VMEM((Bp, H), jnp.float32),           # c state
        ],
        compiler_params=pltpu.CompilerParams(
            vmem_limit_bytes=32 * 1024 * 1024),
    )(emb2d, wih_t, whh_t, bias, fcw_t, fcb)

    return logits_p[:B, :C], None


def _reference_forward(tokens, embedding_matrix, w_ih, w_hh, b_ih, b_hh,
                       fc_w, fc_b):
    """Pure-JAX reference mirroring torch.nn.LSTM gate math (same bf16
    matmul operands / f32 accumulation as the kernel)."""
    B, T = tokens.shape
    H = w_hh.shape[1]
    emb = embedding_matrix[tokens].astype(jnp.float32)           # (B, T, E)
    wih_t = w_ih.T.astype(jnp.bfloat16)
    whh_t = w_hh.T.astype(jnp.bfloat16)
    bias = (b_ih + b_hh).astype(jnp.float32)
    h = jnp.zeros((B, H), jnp.float32)
    c = jnp.zeros((B, H), jnp.float32)

    def step(carry, x_t):
        h, c = carry
        gates = (jnp.dot(x_t.astype(jnp.bfloat16), wih_t,
                         preferred_element_type=jnp.float32)
                 + jnp.dot(h.astype(jnp.bfloat16), whh_t,
                           preferred_element_type=jnp.float32)
                 + bias)
        i, f, g, o = jnp.split(gates, 4, axis=1)
        i, f, o = jax.nn.sigmoid(i), jax.nn.sigmoid(f), jax.nn.sigmoid(o)
        g = jnp.tanh(g)
        c = f * c + i * g
        h = o * jnp.tanh(c)
        return (h, c), None

    (h, c), _ = lax.scan(step, (h, c), jnp.transpose(emb, (1, 0, 2)))
    return (jnp.dot(h.astype(jnp.bfloat16), fc_w.T.astype(jnp.bfloat16),
                    preferred_element_type=jnp.float32) + fc_b)


if __name__ == "__main__":
    # Small deterministic configuration (hidden_size matches the module's
    # default of 128, which also makes 4H = 512 lane-dense).
    B, T = 2, 8          # batch, sequence length
    V, E = 50, 128       # vocab size, embedding dim
    H, C = 128, 2        # hidden size, num classes

    key = jax.random.PRNGKey(0)
    k_emb, k_wih, k_whh, k_bih, k_bhh, k_fcw, k_fcb, k_tok = jax.random.split(key, 8)

    embedding_matrix = jax.random.normal(k_emb, (V, E), jnp.float32) * 0.1
    w_ih = jax.random.normal(k_wih, (4 * H, E), jnp.float32) * 0.1
    w_hh = jax.random.normal(k_whh, (4 * H, H), jnp.float32) * 0.1
    b_ih = jax.random.normal(k_bih, (4 * H,), jnp.float32) * 0.1
    b_hh = jax.random.normal(k_bhh, (4 * H,), jnp.float32) * 0.1
    fc_w = jax.random.normal(k_fcw, (C, H), jnp.float32) * 0.1
    fc_b = jax.random.normal(k_fcb, (C,), jnp.float32) * 0.1

    tokens = jax.random.randint(k_tok, (B, T), 0, V, dtype=jnp.int32)

    logits, attn = sentiment_rnn_forward(
        tokens, embedding_matrix, w_ih, w_hh, b_ih, b_hh, fc_w, fc_b)
    logits = jax.block_until_ready(logits)

    ref = _reference_forward(
        tokens, embedding_matrix, w_ih, w_hh, b_ih, b_hh, fc_w, fc_b)
    assert attn is None
    assert logits.shape == (B, C)
    assert jnp.allclose(logits, ref, atol=1e-3, rtol=1e-3), (logits, ref)

    print("KERNEL_OK")
</pallas_src>

<mosaic_0001>
module attributes {stable_mosaic.version = 11 : i64} {
  func.func @lstm_fc_kernel(%arg0: memref<64x128xbf16, #tpu.memory_space<vmem>>, %arg1: memref<128x512xbf16, #tpu.memory_space<vmem>>, %arg2: memref<128x512xbf16, #tpu.memory_space<vmem>>, %arg3: memref<1x512xf32, #tpu.memory_space<vmem>>, %arg4: memref<128x128xbf16, #tpu.memory_space<vmem>>, %arg5: memref<1x128xf32, #tpu.memory_space<vmem>>, %arg6: memref<8x128xf32, #tpu.memory_space<vmem>>, %arg7: memref<64x512xf32, #tpu.memory_space<vmem>>, %arg8: memref<8x128xf32, #tpu.memory_space<vmem>>, %arg9: memref<8x128xf32, #tpu.memory_space<vmem>>) attributes {dimension_semantics = [], scalar_prefetch = 0 : i64, scratch_operands = 3 : i64, tpu.core_type = #tpu.core_type<tc>} {
    %c0 = arith.constant 0 : index
    %c0_0 = arith.constant 0 : index
    %0 = vector.load %arg0[%c0, %c0_0] : memref<64x128xbf16, #tpu.memory_space<vmem>>, vector<64x128xbf16>
    %c0_1 = arith.constant 0 : index
    %c0_2 = arith.constant 0 : index
    %1 = vector.load %arg1[%c0_1, %c0_2] : memref<128x512xbf16, #tpu.memory_space<vmem>>, vector<128x512xbf16>
    %cst = arith.constant dense<0.000000e+00> : vector<64x512xf32>
    %2 = tpu.matmul %0, %1, %cst {dimension_numbers = #tpu.dot_dimension_numbers<[1], [0], [0], [1], [0, 0, 1, 1], [], []>} : vector<64x128xbf16>, vector<128x512xbf16>, vector<64x512xf32> -> vector<64x512xf32>
    %c0_3 = arith.constant 0 : index
    %c0_4 = arith.constant 0 : index
    %3 = vector.load %arg3[%c0_3, %c0_4] : memref<1x512xf32, #tpu.memory_space<vmem>>, vector<1x512xf32>
    %4 = vector.broadcast %3 : vector<1x512xf32> to vector<64x512xf32>
    %5 = arith.addf %2, %4 : vector<64x512xf32>
    %c0_5 = arith.constant 0 : index
    %c0_6 = arith.constant 0 : index
    %6 = vector.load %arg7[%c0_5, %c0_6] : memref<64x512xf32, #tpu.memory_space<vmem>>, vector<64x512xf32>
    tpu.vector_store %arg7[%c0_5, %c0_6], %5 {strides = array<i32>} : memref<64x512xf32, #tpu.memory_space<vmem>>, vector<64x512xf32>,
    %cst_7 = arith.constant 0.000000e+00 : f32
    %7 = vector.broadcast %cst_7 : f32 to vector<8x128xf32>
    %c0_8 = arith.constant 0 : index
    %c0_9 = arith.constant 0 : index
    %8 = vector.load %arg8[%c0_8, %c0_9] : memref<8x128xf32, #tpu.memory_space<vmem>>, vector<8x128xf32>
    tpu.vector_store %arg8[%c0_8, %c0_9], %7 {strides = array<i32>} : memref<8x128xf32, #tpu.memory_space<vmem>>, vector<8x128xf32>,
    %cst_10 = arith.constant 0.000000e+00 : f32
    %9 = vector.broadcast %cst_10 : f32 to vector<8x128xf32>
    %c0_11 = arith.constant 0 : index
    %c0_12 = arith.constant 0 : index
    %10 = vector.load %arg9[%c0_11, %c0_12] : memref<8x128xf32, #tpu.memory_space<vmem>>, vector<8x128xf32>
    tpu.vector_store %arg9[%c0_11, %c0_12], %9 {strides = array<i32>} : memref<8x128xf32, #tpu.memory_space<vmem>>, vector<8x128xf32>,
    %c0_i32 = arith.constant 0 : i32
    %c8_i32 = arith.constant 8 : i32
    %11 = arith.muli %c0_i32, %c8_i32 : i32
    %12 = tpu.assume_multiple %11, 8 : i32
    %13 = arith.index_cast %12 : i32 to index
    %c0_13 = arith.constant 0 : index
    %14 = vector.load %arg7[%13, %c0_13] : memref<64x512xf32, #tpu.memory_space<vmem>>, vector<8x512xf32>
    %c0_14 = arith.constant 0 : index
    %c0_15 = arith.constant 0 : index
    %15 = vector.load %arg8[%c0_14, %c0_15] : memref<8x128xf32, #tpu.memory_space<vmem>>, vector<8x128xf32>
    %16 = arith.truncf %15 : vector<8x128xf32> to vector<8x128xbf16>
    %c0_16 = arith.constant 0 : index
    %c0_17 = arith.constant 0 : index
    %17 = vector.load %arg2[%c0_16, %c0_17] : memref<128x512xbf16, #tpu.memory_space<vmem>>, vector<128x512xbf16>
    %cst_18 = arith.constant dense<0.000000e+00> : vector<8x512xf32>
    %18 = tpu.matmul %16, %17, %cst_18 {dimension_numbers = #tpu.dot_dimension_numbers<[1], [0], [0], [1], [0, 0, 1, 1], [], []>} : vector<8x128xbf16>, vector<128x512xbf16>, vector<8x512xf32> -> vector<8x512xf32>
    %19 = arith.addf %14, %18 : vector<8x512xf32>
    %20 = vector.extract_strided_slice %19 {offsets = [0, 0], sizes = [8, 128], strides = [1, 1]} : vector<8x512xf32> to vector<8x128xf32>
    %21 = arith.negf %20 : vector<8x128xf32>
    %22 = math.exp %21 : vector<8x128xf32>
    %cst_19 = arith.constant 1.000000e+00 : f32
    %23 = vector.broadcast %cst_19 : f32 to vector<8x128xf32>
    %24 = arith.addf %23, %22 : vector<8x128xf32>
    %25 = arith.divf %23, %24 : vector<8x128xf32>
    %26 = vector.extract_strided_slice %19 {offsets = [0, 128], sizes = [8, 128], strides = [1, 1]} : vector<8x512xf32> to vector<8x128xf32>
    %27 = arith.negf %26 : vector<8x128xf32>
    %28 = math.exp %27 : vector<8x128xf32>
    %cst_20 = arith.constant 1.000000e+00 : f32
    %29 = vector.broadcast %cst_20 : f32 to vector<8x128xf32>
    %30 = arith.addf %29, %28 : vector<8x128xf32>
    %31 = arith.divf %29, %30 : vector<8x128xf32>
    %32 = vector.extract_strided_slice %19 {offsets = [0, 256], sizes = [8, 128], strides = [1, 1]} : vector<8x512xf32> to vector<8x128xf32>
    %33 = math.tanh %32 : vector<8x128xf32>
    %34 = vector.extract_strided_slice %19 {offsets = [0, 384], sizes = [8, 128], strides = [1, 1]} : vector<8x512xf32> to vector<8x128xf32>
    %35 = arith.negf %34 : vector<8x128xf32>
    %36 = math.exp %35 : vector<8x128xf32>
    %cst_21 = arith.constant 1.000000e+00 : f32
    %37 = vector.broadcast %cst_21 : f32 to vector<8x128xf32>
    %38 = arith.addf %37, %36 : vector<8x128xf32>
    %39 = arith.divf %37, %38 : vector<8x128xf32>
    %c0_22 = arith.constant 0 : index
    %c0_23 = arith.constant 0 : index
    %40 = vector.load %arg9[%c0_22, %c0_23] : memref<8x128xf32, #tpu.memory_space<vmem>>, vector<8x128xf32>
    %41 = arith.mulf %31, %40 : vector<8x128xf32>
    %42 = arith.mulf %25, %33 : vector<8x128xf32>
    %43 = arith.addf %41, %42 : vector<8x128xf32>
    %c0_24 = arith.constant 0 : index
    %c0_25 = arith.constant 0 : index
    %44 = vector.load %arg9[%c0_24, %c0_25] : memref<8x128xf32, #tpu.memory_space<vmem>>, vector<8x128xf32>
    tpu.vector_store %arg9[%c0_24, %c0_25], %43 {strides = array<i32>} : memref<8x128xf32, #tpu.memory_space<vmem>>, vector<8x128xf32>,
    %45 = math.tanh %43 : vector<8x128xf32>
    %46 = arith.mulf %39, %45 : vector<8x128xf32>
    %c0_26 = arith.constant 0 : index
    %c0_27 = arith.constant 0 : index
    %47 = vector.load %arg8[%c0_26, %c0_27] : memref<8x128xf32, #tpu.memory_space<vmem>>, vector<8x128xf32>
    tpu.vector_store %arg8[%c0_26, %c0_27], %46 {strides = array<i32>} : memref<8x128xf32, #tpu.memory_space<vmem>>, vector<8x128xf32>,
    %c1_i32 = arith.constant 1 : i32
    %c8_i32_28 = arith.constant 8 : i32
    %48 = arith.muli %c1_i32, %c8_i32_28 : i32
    %49 = tpu.assume_multiple %48, 8 : i32
    %50 = arith.index_cast %49 : i32 to index
    %c0_29 = arith.constant 0 : index
    %51 = vector.load %arg7[%50, %c0_29] : memref<64x512xf32, #tpu.memory_space<vmem>>, vector<8x512xf32>
    %c0_30 = arith.constant 0 : index
    %c0_31 = arith.constant 0 : index
    %52 = vector.load %arg8[%c0_30, %c0_31] : memref<8x128xf32, #tpu.memory_space<vmem>>, vector<8x128xf32>
    %53 = arith.truncf %52 : vector<8x128xf32> to vector<8x128xbf16>
    %c0_32 = arith.constant 0 : index
    %c0_33 = arith.constant 0 : index
    %54 = vector.load %arg2[%c0_32, %c0_33] : memref<128x512xbf16, #tpu.memory_space<vmem>>, vector<128x512xbf16>
    %cst_34 = arith.constant dense<0.000000e+00> : vector<8x512xf32>
    %55 = tpu.matmul %53, %54, %cst_34 {dimension_numbers = #tpu.dot_dimension_numbers<[1], [0], [0], [1], [0, 0, 1, 1], [], []>} : vector<8x128xbf16>, vector<128x512xbf16>, vector<8x512xf32> -> vector<8x512xf32>
    %56 = arith.addf %51, %55 : vector<8x512xf32>
    %57 = vector.extract_strided_slice %56 {offsets = [0, 0], sizes = [8, 128], strides = [1, 1]} : vector<8x512xf32> to vector<8x128xf32>
    %58 = arith.negf %57 : vector<8x128xf32>
    %59 = math.exp %58 : vector<8x128xf32>
    %cst_35 = arith.constant 1.000000e+00 : f32
    %60 = vector.broadcast %cst_35 : f32 to vector<8x128xf32>
    %61 = arith.addf %60, %59 : vector<8x128xf32>
    %62 = arith.divf %60, %61 : vector<8x128xf32>
    %63 = vector.extract_strided_slice %56 {offsets = [0, 128], sizes = [8, 128], strides = [1, 1]} : vector<8x512xf32> to vector<8x128xf32>
    %64 = arith.negf %63 : vector<8x128xf32>
    %65 = math.exp %64 : vector<8x128xf32>
    %cst_36 = arith.constant 1.000000e+00 : f32
    %66 = vector.broadcast %cst_36 : f32 to vector<8x128xf32>
    %67 = arith.addf %66, %65 : vector<8x128xf32>
    %68 = arith.divf %66, %67 : vector<8x128xf32>
    %69 = vector.extract_strided_slice %56 {offsets = [0, 256], sizes = [8, 128], strides = [1, 1]} : vector<8x512xf32> to vector<8x128xf32>
    %70 = math.tanh %69 : vector<8x128xf32>
    %71 = vector.extract_strided_slice %56 {offsets = [0, 384], sizes = [8, 128], strides = [1, 1]} : vector<8x512xf32> to vector<8x128xf32>
    %72 = arith.negf %71 : vector<8x128xf32>
    %73 = math.exp %72 : vector<8x128xf32>
    %cst_37 = arith.constant 1.000000e+00 : f32
    %74 = vector.broadcast %cst_37 : f32 to vector<8x128xf32>
    %75 = arith.addf %74, %73 : vector<8x128xf32>
    %76 = arith.divf %74, %75 : vector<8x128xf32>
    %c0_38 = arith.constant 0 : index
    %c0_39 = arith.constant 0 : index
    %77 = vector.load %arg9[%c0_38, %c0_39] : memref<8x128xf32, #tpu.memory_space<vmem>>, vector<8x128xf32>
    %78 = arith.mulf %68, %77 : vector<8x128xf32>
    %79 = arith.mulf %62, %70 : vector<8x128xf32>
    %80 = arith.addf %78, %79 : vector<8x128xf32>
    %c0_40 = arith.constant 0 : index
    %c0_41 = arith.constant 0 : index
    %81 = vector.load %arg9[%c0_40, %c0_41] : memref<8x128xf32, #tpu.memory_space<vmem>>, vector<8x128xf32>
    tpu.vector_store %arg9[%c0_40, %c0_41], %80 {strides = array<i32>} : memref<8x128xf32, #tpu.memory_space<vmem>>, vector<8x128xf32>,
    %82 = math.tanh %80 : vector<8x128xf32>
    %83 = arith.mulf %76, %82 : vector<8x128xf32>
    %c0_42 = arith.constant 0 : index
    %c0_43 = arith.constant 0 : index
    %84 = vector.load %arg8[%c0_42, %c0_43] : memref<8x128xf32, #tpu.memory_space<vmem>>, vector<8x128xf32>
    tpu.vector_store %arg8[%c0_42, %c0_43], %83 {strides = array<i32>} : memref<8x128xf32, #tpu.memory_space<vmem>>, vector<8x128xf32>,
    %c2_i32 = arith.constant 2 : i32
    %c8_i32_44 = arith.constant 8 : i32
    %85 = arith.muli %c2_i32, %c8_i32_44 : i32
    %86 = tpu.assume_multiple %85, 8 : i32
    %87 = arith.index_cast %86 : i32 to index
    %c0_45 = arith.constant 0 : index
    %88 = vector.load %arg7[%87, %c0_45] : memref<64x512xf32, #tpu.memory_space<vmem>>, vector<8x512xf32>
    %c0_46 = arith.constant 0 : index
    %c0_47 = arith.constant 0 : index
    %89 = vector.load %arg8[%c0_46, %c0_47] : memref<8x128xf32, #tpu.memory_space<vmem>>, vector<8x128xf32>
    %90 = arith.truncf %89 : vector<8x128xf32> to vector<8x128xbf16>
    %c0_48 = arith.constant 0 : index
    %c0_49 = arith.constant 0 : index
    %91 = vector.load %arg2[%c0_48, %c0_49] : memref<128x512xbf16, #tpu.memory_space<vmem>>, vector<128x512xbf16>
    %cst_50 = arith.constant dense<0.000000e+00> : vector<8x512xf32>
    %92 = tpu.matmul %90, %91, %cst_50 {dimension_numbers = #tpu.dot_dimension_numbers<[1], [0], [0], [1], [0, 0, 1, 1], [], []>} : vector<8x128xbf16>, vector<128x512xbf16>, vector<8x512xf32> -> vector<8x512xf32>
    %93 = arith.addf %88, %92 : vector<8x512xf32>
    %94 = vector.extract_strided_slice %93 {offsets = [0, 0], sizes = [8, 128], strides = [1, 1]} : vector<8x512xf32> to vector<8x128xf32>
    %95 = arith.negf %94 : vector<8x128xf32>
    %96 = math.exp %95 : vector<8x128xf32>
    %cst_51 = arith.constant 1.000000e+00 : f32
    %97 = vector.broadcast %cst_51 : f32 to vector<8x128xf32>
    %98 = arith.addf %97, %96 : vector<8x128xf32>
    %99 = arith.divf %97, %98 : vector<8x128xf32>
    %100 = vector.extract_strided_slice %93 {offsets = [0, 128], sizes = [8, 128], strides = [1, 1]} : vector<8x512xf32> to vector<8x128xf32>
    %101 = arith.negf %100 : vector<8x128xf32>
    %102 = math.exp %101 : vector<8x128xf32>
    %cst_52 = arith.constant 1.000000e+00 : f32
    %103 = vector.broadcast %cst_52 : f32 to vector<8x128xf32>
    %104 = arith.addf %103, %102 : vector<8x128xf32>
    %105 = arith.divf %103, %104 : vector<8x128xf32>
    %106 = vector.extract_strided_slice %93 {offsets = [0, 256], sizes = [8, 128], strides = [1, 1]} : vector<8x512xf32> to vector<8x128xf32>
    %107 = math.tanh %106 : vector<8x128xf32>
    %108 = vector.extract_strided_slice %93 {offsets = [0, 384], sizes = [8, 128], strides = [1, 1]} : vector<8x512xf32> to vector<8x128xf32>
    %109 = arith.negf %108 : vector<8x128xf32>
    %110 = math.exp %109 : vector<8x128xf32>
    %cst_53 = arith.constant 1.000000e+00 : f32
    %111 = vector.broadcast %cst_53 : f32 to vector<8x128xf32>
    %112 = arith.addf %111, %110 : vector<8x128xf32>
    %113 = arith.divf %111, %112 : vector<8x128xf32>
    %c0_54 = arith.constant 0 : index
    %c0_55 = arith.constant 0 : index
    %114 = vector.load %arg9[%c0_54, %c0_55] : memref<8x128xf32, #tpu.memory_space<vmem>>, vector<8x128xf32>
    %115 = arith.mulf %105, %114 : vector<8x128xf32>
    %116 = arith.mulf %99, %107 : vector<8x128xf32>
    %117 = arith.addf %115, %116 : vector<8x128xf32>
    %c0_56 = arith.constant 0 : index
    %c0_57 = arith.constant 0 : index
    %118 = vector.load %arg9[%c0_56, %c0_57] : memref<8x128xf32, #tpu.memory_space<vmem>>, vector<8x128xf32>
    tpu.vector_store %arg9[%c0_56, %c0_57], %117 {strides = array<i32>} : memref<8x128xf32, #tpu.memory_space<vmem>>, vector<8x128xf32>,
    %119 = math.tanh %117 : vector<8x128xf32>
    %120 = arith.mulf %113, %119 : vector<8x128xf32>
    %c0_58 = arith.constant 0 : index
    %c0_59 = arith.constant 0 : index
    %121 = vector.load %arg8[%c0_58, %c0_59] : memref<8x128xf32, #tpu.memory_space<vmem>>, vector<8x128xf32>
    tpu.vector_store %arg8[%c0_58, %c0_59], %120 {strides = array<i32>} : memref<8x128xf32, #tpu.memory_space<vmem>>, vector<8x128xf32>,
    %c3_i32 = arith.constant 3 : i32
    %c8_i32_60 = arith.constant 8 : i32
    %122 = arith.muli %c3_i32, %c8_i32_60 : i32
    %123 = tpu.assume_multiple %122, 8 : i32
    %124 = arith.index_cast %123 : i32 to index
    %c0_61 = arith.constant 0 : index
    %125 = vector.load %arg7[%124, %c0_61] : memref<64x512xf32, #tpu.memory_space<vmem>>, vector<8x512xf32>
    %c0_62 = arith.constant 0 : index
    %c0_63 = arith.constant 0 : index
    %126 = vector.load %arg8[%c0_62, %c0_63] : memref<8x128xf32, #tpu.memory_space<vmem>>, vector<8x128xf32>
    %127 = arith.truncf %126 : vector<8x128xf32> to vector<8x128xbf16>
    %c0_64 = arith.constant 0 : index
    %c0_65 = arith.constant 0 : index
    %128 = vector.load %arg2[%c0_64, %c0_65] : memref<128x512xbf16, #tpu.memory_space<vmem>>, vector<128x512xbf16>
    %cst_66 = arith.constant dense<0.000000e+00> : vector<8x512xf32>
    %129 = tpu.matmul %127, %128, %cst_66 {dimension_numbers = #tpu.dot_dimension_numbers<[1], [0], [0], [1], [0, 0, 1, 1], [], []>} : vector<8x128xbf16>, vector<128x512xbf16>, vector<8x512xf32> -> vector<8x512xf32>
    %130 = arith.addf %125, %129 : vector<8x512xf32>
    %131 = vector.extract_strided_slice %130 {offsets = [0, 0], sizes = [8, 128], strides = [1, 1]} : vector<8x512xf32> to vector<8x128xf32>
    %132 = arith.negf %131 : vector<8x128xf32>
    %133 = math.exp %132 : vector<8x128xf32>
    %cst_67 = arith.constant 1.000000e+00 : f32
    %134 = vector.broadcast %cst_67 : f32 to vector<8x128xf32>
    %135 = arith.addf %134, %133 : vector<8x128xf32>
    %136 = arith.divf %134, %135 : vector<8x128xf32>
    %137 = vector.extract_strided_slice %130 {offsets = [0, 128], sizes = [8, 128], strides = [1, 1]} : vector<8x512xf32> to vector<8x128xf32>
    %138 = arith.negf %137 : vector<8x128xf32>
    %139 = math.exp %138 : vector<8x128xf32>
    %cst_68 = arith.constant 1.000000e+00 : f32
    %140 = vector.broadcast %cst_68 : f32 to vector<8x128xf32>
    %141 = arith.addf %140, %139 : vector<8x128xf32>
    %142 = arith.divf %140, %141 : vector<8x128xf32>
    %143 = vector.extract_strided_slice %130 {offsets = [0, 256], sizes = [8, 128], strides = [1, 1]} : vector<8x512xf32> to vector<8x128xf32>
    %144 = math.tanh %143 : vector<8x128xf32>
    %145 = vector.extract_strided_slice %130 {offsets = [0, 384], sizes = [8, 128], strides = [1, 1]} : vector<8x512xf32> to vector<8x128xf32>
    %146 = arith.negf %145 : vector<8x128xf32>
    %147 = math.exp %146 : vector<8x128xf32>
    %cst_69 = arith.constant 1.000000e+00 : f32
    %148 = vector.broadcast %cst_69 : f32 to vector<8x128xf32>
    %149 = arith.addf %148, %147 : vector<8x128xf32>
    %150 = arith.divf %148, %149 : vector<8x128xf32>
    %c0_70 = arith.constant 0 : index
    %c0_71 = arith.constant 0 : index
    %151 = vector.load %arg9[%c0_70, %c0_71] : memref<8x128xf32, #tpu.memory_space<vmem>>, vector<8x128xf32>
    %152 = arith.mulf %142, %151 : vector<8x128xf32>
    %153 = arith.mulf %136, %144 : vector<8x128xf32>
    %154 = arith.addf %152, %153 : vector<8x128xf32>
    %c0_72 = arith.constant 0 : index
    %c0_73 = arith.constant 0 : index
    %155 = vector.load %arg9[%c0_72, %c0_73] : memref<8x128xf32, #tpu.memory_space<vmem>>, vector<8x128xf32>
    tpu.vector_store %arg9[%c0_72, %c0_73], %154 {strides = array<i32>} : memref<8x128xf32, #tpu.memory_space<vmem>>, vector<8x128xf32>,
    %156 = math.tanh %154 : vector<8x128xf32>
    %157 = arith.mulf %150, %156 : vector<8x128xf32>
    %c0_74 = arith.constant 0 : index
    %c0_75 = arith.constant 0 : index
    %158 = vector.load %arg8[%c0_74, %c0_75] : memref<8x128xf32, #tpu.memory_space<vmem>>, vector<8x128xf32>
    tpu.vector_store %arg8[%c0_74, %c0_75], %157 {strides = array<i32>} : memref<8x128xf32, #tpu.memory_space<vmem>>, vector<8x128xf32>,
    %c4_i32 = arith.constant 4 : i32
    %c8_i32_76 = arith.constant 8 : i32
    %159 = arith.muli %c4_i32, %c8_i32_76 : i32
    %160 = tpu.assume_multiple %159, 8 : i32
    %161 = arith.index_cast %160 : i32 to index
    %c0_77 = arith.constant 0 : index
    %162 = vector.load %arg7[%161, %c0_77] : memref<64x512xf32, #tpu.memory_space<vmem>>, vector<8x512xf32>
    %c0_78 = arith.constant 0 : index
    %c0_79 = arith.constant 0 : index
    %163 = vector.load %arg8[%c0_78, %c0_79] : memref<8x128xf32, #tpu.memory_space<vmem>>, vector<8x128xf32>
    %164 = arith.truncf %163 : vector<8x128xf32> to vector<8x128xbf16>
    %c0_80 = arith.constant 0 : index
    %c0_81 = arith.constant 0 : index
    %165 = vector.load %arg2[%c0_80, %c0_81] : memref<128x512xbf16, #tpu.memory_space<vmem>>, vector<128x512xbf16>
    %cst_82 = arith.constant dense<0.000000e+00> : vector<8x512xf32>
    %166 = tpu.matmul %164, %165, %cst_82 {dimension_numbers = #tpu.dot_dimension_numbers<[1], [0], [0], [1], [0, 0, 1, 1], [], []>} : vector<8x128xbf16>, vector<128x512xbf16>, vector<8x512xf32> -> vector<8x512xf32>
    %167 = arith.addf %162, %166 : vector<8x512xf32>
    %168 = vector.extract_strided_slice %167 {offsets = [0, 0], sizes = [8, 128], strides = [1, 1]} : vector<8x512xf32> to vector<8x128xf32>
    %169 = arith.negf %168 : vector<8x128xf32>
    %170 = math.exp %169 : vector<8x128xf32>
    %cst_83 = arith.constant 1.000000e+00 : f32
    %171 = vector.broadcast %cst_83 : f32 to vector<8x128xf32>
    %172 = arith.addf %171, %170 : vector<8x128xf32>
    %173 = arith.divf %171, %172 : vector<8x128xf32>
    %174 = vector.extract_strided_slice %167 {offsets = [0, 128], sizes = [8, 128], strides = [1, 1]} : vector<8x512xf32> to vector<8x128xf32>
    %175 = arith.negf %174 : vector<8x128xf32>
    %176 = math.exp %175 : vector<8x128xf32>
    %cst_84 = arith.constant 1.000000e+00 : f32
    %177 = vector.broadcast %cst_84 : f32 to vector<8x128xf32>
    %178 = arith.addf %177, %176 : vector<8x128xf32>
    %179 = arith.divf %177, %178 : vector<8x128xf32>
    %180 = vector.extract_strided_slice %167 {offsets = [0, 256], sizes = [8, 128], strides = [1, 1]} : vector<8x512xf32> to vector<8x128xf32>
    %181 = math.tanh %180 : vector<8x128xf32>
    %182 = vector.extract_strided_slice %167 {offsets = [0, 384], sizes = [8, 128], strides = [1, 1]} : vector<8x512xf32> to vector<8x128xf32>
    %183 = arith.negf %182 : vector<8x128xf32>
    %184 = math.exp %183 : vector<8x128xf32>
    %cst_85 = arith.constant 1.000000e+00 : f32
    %185 = vector.broadcast %cst_85 : f32 to vector<8x128xf32>
    %186 = arith.addf %185, %184 : vector<8x128xf32>
    %187 = arith.divf %185, %186 : vector<8x128xf32>
    %c0_86 = arith.constant 0 : index
    %c0_87 = arith.constant 0 : index
    %188 = vector.load %arg9[%c0_86, %c0_87] : memref<8x128xf32, #tpu.memory_space<vmem>>, vector<8x128xf32>
    %189 = arith.mulf %179, %188 : vector<8x128xf32>
    %190 = arith.mulf %173, %181 : vector<8x128xf32>
    %191 = arith.addf %189, %190 : vector<8x128xf32>
    %c0_88 = arith.constant 0 : index
    %c0_89 = arith.constant 0 : index
    %192 = vector.load %arg9[%c0_88, %c0_89] : memref<8x128xf32, #tpu.memory_space<vmem>>, vector<8x128xf32>
    tpu.vector_store %arg9[%c0_88, %c0_89], %191 {strides = array<i32>} : memref<8x128xf32, #tpu.memory_space<vmem>>, vector<8x128xf32>,
    %193 = math.tanh %191 : vector<8x128xf32>
    %194 = arith.mulf %187, %193 : vector<8x128xf32>
    %c0_90 = arith.constant 0 : index
    %c0_91 = arith.constant 0 : index
    %195 = vector.load %arg8[%c0_90, %c0_91] : memref<8x128xf32, #tpu.memory_space<vmem>>, vector<8x128xf32>
    tpu.vector_store %arg8[%c0_90, %c0_91], %194 {strides = array<i32>} : memref<8x128xf32, #tpu.memory_space<vmem>>, vector<8x128xf32>,
    %c5_i32 = arith.constant 5 : i32
    %c8_i32_92 = arith.constant 8 : i32
    %196 = arith.muli %c5_i32, %c8_i32_92 : i32
    %197 = tpu.assume_multiple %196, 8 : i32
    %198 = arith.index_cast %197 : i32 to index
    %c0_93 = arith.constant 0 : index
    %199 = vector.load %arg7[%198, %c0_93] : memref<64x512xf32, #tpu.memory_space<vmem>>, vector<8x512xf32>
    %c0_94 = arith.constant 0 : index
    %c0_95 = arith.constant 0 : index
    %200 = vector.load %arg8[%c0_94, %c0_95] : memref<8x128xf32, #tpu.memory_space<vmem>>, vector<8x128xf32>
    %201 = arith.truncf %200 : vector<8x128xf32> to vector<8x128xbf16>
    %c0_96 = arith.constant 0 : index
    %c0_97 = arith.constant 0 : index
    %202 = vector.load %arg2[%c0_96, %c0_97] : memref<128x512xbf16, #tpu.memory_space<vmem>>, vector<128x512xbf16>
    %cst_98 = arith.constant dense<0.000000e+00> : vector<8x512xf32>
    %203 = tpu.matmul %201, %202, %cst_98 {dimension_numbers = #tpu.dot_dimension_numbers<[1], [0], [0], [1], [0, 0, 1, 1], [], []>} : vector<8x128xbf16>, vector<128x512xbf16>, vector<8x512xf32> -> vector<8x512xf32>
    %204 = arith.addf %199, %203 : vector<8x512xf32>
    %205 = vector.extract_strided_slice %204 {offsets = [0, 0], sizes = [8, 128], strides = [1, 1]} : vector<8x512xf32> to vector<8x128xf32>
    %206 = arith.negf %205 : vector<8x128xf32>
    %207 = math.exp %206 : vector<8x128xf32>
    %cst_99 = arith.constant 1.000000e+00 : f32
    %208 = vector.broadcast %cst_99 : f32 to vector<8x128xf32>
    %209 = arith.addf %208, %207 : vector<8x128xf32>
    %210 = arith.divf %208, %209 : vector<8x128xf32>
    %211 = vector.extract_strided_slice %204 {offsets = [0, 128], sizes = [8, 128], strides = [1, 1]} : vector<8x512xf32> to vector<8x128xf32>
    %212 = arith.negf %211 : vector<8x128xf32>
    %213 = math.exp %212 : vector<8x128xf32>
    %cst_100 = arith.constant 1.000000e+00 : f32
    %214 = vector.broadcast %cst_100 : f32 to vector<8x128xf32>
    %215 = arith.addf %214, %213 : vector<8x128xf32>
    %216 = arith.divf %214, %215 : vector<8x128xf32>
    %217 = vector.extract_strided_slice %204 {offsets = [0, 256], sizes = [8, 128], strides = [1, 1]} : vector<8x512xf32> to vector<8x128xf32>
    %218 = math.tanh %217 : vector<8x128xf32>
    %219 = vector.extract_strided_slice %204 {offsets = [0, 384], sizes = [8, 128], strides = [1, 1]} : vector<8x512xf32> to vector<8x128xf32>
    %220 = arith.negf %219 : vector<8x128xf32>
    %221 = math.exp %220 : vector<8x128xf32>
    %cst_101 = arith.constant 1.000000e+00 : f32
    %222 = vector.broadcast %cst_101 : f32 to vector<8x128xf32>
    %223 = arith.addf %222, %221 : vector<8x128xf32>
    %224 = arith.divf %222, %223 : vector<8x128xf32>
    %c0_102 = arith.constant 0 : index
    %c0_103 = arith.constant 0 : index
    %225 = vector.load %arg9[%c0_102, %c0_103] : memref<8x128xf32, #tpu.memory_space<vmem>>, vector<8x128xf32>
    %226 = arith.mulf %216, %225 : vector<8x128xf32>
    %227 = arith.mulf %210, %218 : vector<8x128xf32>
    %228 = arith.addf %226, %227 : vector<8x128xf32>
    %c0_104 = arith.constant 0 : index
    %c0_105 = arith.constant 0 : index
    %229 = vector.load %arg9[%c0_104, %c0_105] : memref<8x128xf32, #tpu.memory_space<vmem>>, vector<8x128xf32>
    tpu.vector_store %arg9[%c0_104, %c0_105], %228 {strides = array<i32>} : memref<8x128xf32, #tpu.memory_space<vmem>>, vector<8x128xf32>,
    %230 = math.tanh %228 : vector<8x128xf32>
    %231 = arith.mulf %224, %230 : vector<8x128xf32>
    %c0_106 = arith.constant 0 : index
    %c0_107 = arith.constant 0 : index
    %232 = vector.load %arg8[%c0_106, %c0_107] : memref<8x128xf32, #tpu.memory_space<vmem>>, vector<8x128xf32>
    tpu.vector_store %arg8[%c0_106, %c0_107], %231 {strides = array<i32>} : memref<8x128xf32, #tpu.memory_space<vmem>>, vector<8x128xf32>,
    %c6_i32 = arith.constant 6 : i32
    %c8_i32_108 = arith.constant 8 : i32
    %233 = arith.muli %c6_i32, %c8_i32_108 : i32
    %234 = tpu.assume_multiple %233, 8 : i32
    %235 = arith.index_cast %234 : i32 to index
    %c0_109 = arith.constant 0 : index
    %236 = vector.load %arg7[%235, %c0_109] : memref<64x512xf32, #tpu.memory_space<vmem>>, vector<8x512xf32>
    %c0_110 = arith.constant 0 : index
    %c0_111 = arith.constant 0 : index
    %237 = vector.load %arg8[%c0_110, %c0_111] : memref<8x128xf32, #tpu.memory_space<vmem>>, vector<8x128xf32>
    %238 = arith.truncf %237 : vector<8x128xf32> to vector<8x128xbf16>
    %c0_112 = arith.constant 0 : index
    %c0_113 = arith.constant 0 : index
    %239 = vector.load %arg2[%c0_112, %c0_113] : memref<128x512xbf16, #tpu.memory_space<vmem>>, vector<128x512xbf16>
    %cst_114 = arith.constant dense<0.000000e+00> : vector<8x512xf32>
    %240 = tpu.matmul %238, %239, %cst_114 {dimension_numbers = #tpu.dot_dimension_numbers<[1], [0], [0], [1], [0, 0, 1, 1], [], []>} : vector<8x128xbf16>, vector<128x512xbf16>, vector<8x512xf32> -> vector<8x512xf32>
    %241 = arith.addf %236, %240 : vector<8x512xf32>
    %242 = vector.extract_strided_slice %241 {offsets = [0, 0], sizes = [8, 128], strides = [1, 1]} : vector<8x512xf32> to vector<8x128xf32>
    %243 = arith.negf %242 : vector<8x128xf32>
    %244 = math.exp %243 : vector<8x128xf32>
    %cst_115 = arith.constant 1.000000e+00 : f32
    %245 = vector.broadcast %cst_115 : f32 to vector<8x128xf32>
    %246 = arith.addf %245, %244 : vector<8x128xf32>
    %247 = arith.divf %245, %246 : vector<8x128xf32>
    %248 = vector.extract_strided_slice %241 {offsets = [0, 128], sizes = [8, 128], strides = [1, 1]} : vector<8x512xf32> to vector<8x128xf32>
    %249 = arith.negf %248 : vector<8x128xf32>
    %250 = math.exp %249 : vector<8x128xf32>
    %cst_116 = arith.constant 1.000000e+00 : f32
    %251 = vector.broadcast %cst_116 : f32 to vector<8x128xf32>
    %252 = arith.addf %251, %250 : vector<8x128xf32>
    %253 = arith.divf %251, %252 : vector<8x128xf32>
    %254 = vector.extract_strided_slice %241 {offsets = [0, 256], sizes = [8, 128], strides = [1, 1]} : vector<8x512xf32> to vector<8x128xf32>
    %255 = math.tanh %254 : vector<8x128xf32>
    %256 = vector.extract_strided_slice %241 {offsets = [0, 384], sizes = [8, 128], strides = [1, 1]} : vector<8x512xf32> to vector<8x128xf32>
    %257 = arith.negf %256 : vector<8x128xf32>
    %258 = math.exp %257 : vector<8x128xf32>
    %cst_117 = arith.constant 1.000000e+00 : f32
    %259 = vector.broadcast %cst_117 : f32 to vector<8x128xf32>
    %260 = arith.addf %259, %258 : vector<8x128xf32>
    %261 = arith.divf %259, %260 : vector<8x128xf32>
    %c0_118 = arith.constant 0 : index
    %c0_119 = arith.constant 0 : index
    %262 = vector.load %arg9[%c0_118, %c0_119] : memref<8x128xf32, #tpu.memory_space<vmem>>, vector<8x128xf32>
    %263 = arith.mulf %253, %262 : vector<8x128xf32>
    %264 = arith.mulf %247, %255 : vector<8x128xf32>
    %265 = arith.addf %263, %264 : vector<8x128xf32>
    %c0_120 = arith.constant 0 : index
    %c0_121 = arith.constant 0 : index
    %266 = vector.load %arg9[%c0_120, %c0_121] : memref<8x128xf32, #tpu.memory_space<vmem>>, vector<8x128xf32>
    tpu.vector_store %arg9[%c0_120, %c0_121], %265 {strides = array<i32>} : memref<8x128xf32, #tpu.memory_space<vmem>>, vector<8x128xf32>,
    %267 = math.tanh %265 : vector<8x128xf32>
    %268 = arith.mulf %261, %267 : vector<8x128xf32>
    %c0_122 = arith.constant 0 : index
    %c0_123 = arith.constant 0 : index
    %269 = vector.load %arg8[%c0_122, %c0_123] : memref<8x128xf32, #tpu.memory_space<vmem>>, vector<8x128xf32>
    tpu.vector_store %arg8[%c0_122, %c0_123], %268 {strides = array<i32>} : memref<8x128xf32, #tpu.memory_space<vmem>>, vector<8x128xf32>,
    %c7_i32 = arith.constant 7 : i32
    %c8_i32_124 = arith.constant 8 : i32
    %270 = arith.muli %c7_i32, %c8_i32_124 : i32
    %271 = tpu.assume_multiple %270, 8 : i32
    %272 = arith.index_cast %271 : i32 to index
    %c0_125 = arith.constant 0 : index
    %273 = vector.load %arg7[%272, %c0_125] : memref<64x512xf32, #tpu.memory_space<vmem>>, vector<8x512xf32>
    %c0_126 = arith.constant 0 : index
    %c0_127 = arith.constant 0 : index
    %274 = vector.load %arg8[%c0_126, %c0_127] : memref<8x128xf32, #tpu.memory_space<vmem>>, vector<8x128xf32>
    %275 = arith.truncf %274 : vector<8x128xf32> to vector<8x128xbf16>
    %c0_128 = arith.constant 0 : index
    %c0_129 = arith.constant 0 : index
    %276 = vector.load %arg2[%c0_128, %c0_129] : memref<128x512xbf16, #tpu.memory_space<vmem>>, vector<128x512xbf16>
    %cst_130 = arith.constant dense<0.000000e+00> : vector<8x512xf32>
    %277 = tpu.matmul %275, %276, %cst_130 {dimension_numbers = #tpu.dot_dimension_numbers<[1], [0], [0], [1], [0, 0, 1, 1], [], []>} : vector<8x128xbf16>, vector<128x512xbf16>, vector<8x512xf32> -> vector<8x512xf32>
    %278 = arith.addf %273, %277 : vector<8x512xf32>
    %279 = vector.extract_strided_slice %278 {offsets = [0, 0], sizes = [8, 128], strides = [1, 1]} : vector<8x512xf32> to vector<8x128xf32>
    %280 = arith.negf %279 : vector<8x128xf32>
    %281 = math.exp %280 : vector<8x128xf32>
    %cst_131 = arith.constant 1.000000e+00 : f32
    %282 = vector.broadcast %cst_131 : f32 to vector<8x128xf32>
    %283 = arith.addf %282, %281 : vector<8x128xf32>
    %284 = arith.divf %282, %283 : vector<8x128xf32>
    %285 = vector.extract_strided_slice %278 {offsets = [0, 128], sizes = [8, 128], strides = [1, 1]} : vector<8x512xf32> to vector<8x128xf32>
    %286 = arith.negf %285 : vector<8x128xf32>
    %287 = math.exp %286 : vector<8x128xf32>
    %cst_132 = arith.constant 1.000000e+00 : f32
    %288 = vector.broadcast %cst_132 : f32 to vector<8x128xf32>
    %289 = arith.addf %288, %287 : vector<8x128xf32>
    %290 = arith.divf %288, %289 : vector<8x128xf32>
    %291 = vector.extract_strided_slice %278 {offsets = [0, 256], sizes = [8, 128], strides = [1, 1]} : vector<8x512xf32> to vector<8x128xf32>
    %292 = math.tanh %291 : vector<8x128xf32>
    %293 = vector.extract_strided_slice %278 {offsets = [0, 384], sizes = [8, 128], strides = [1, 1]} : vector<8x512xf32> to vector<8x128xf32>
    %294 = arith.negf %293 : vector<8x128xf32>
    %295 = math.exp %294 : vector<8x128xf32>
    %cst_133 = arith.constant 1.000000e+00 : f32
    %296 = vector.broadcast %cst_133 : f32 to vector<8x128xf32>
    %297 = arith.addf %296, %295 : vector<8x128xf32>
    %298 = arith.divf %296, %297 : vector<8x128xf32>
    %c0_134 = arith.constant 0 : index
    %c0_135 = arith.constant 0 : index
    %299 = vector.load %arg9[%c0_134, %c0_135] : memref<8x128xf32, #tpu.memory_space<vmem>>, vector<8x128xf32>
    %300 = arith.mulf %290, %299 : vector<8x128xf32>
    %301 = arith.mulf %284, %292 : vector<8x128xf32>
    %302 = arith.addf %300, %301 : vector<8x128xf32>
    %c0_136 = arith.constant 0 : index
    %c0_137 = arith.constant 0 : index
    %303 = vector.load %arg9[%c0_136, %c0_137] : memref<8x128xf32, #tpu.memory_space<vmem>>, vector<8x128xf32>
    tpu.vector_store %arg9[%c0_136, %c0_137], %302 {strides = array<i32>} : memref<8x128xf32, #tpu.memory_space<vmem>>, vector<8x128xf32>,
    %304 = math.tanh %302 : vector<8x128xf32>
    %305 = arith.mulf %298, %304 : vector<8x128xf32>
    %c0_138 = arith.constant 0 : index
    %c0_139 = arith.constant 0 : index
    %306 = vector.load %arg8[%c0_138, %c0_139] : memref<8x128xf32, #tpu.memory_space<vmem>>, vector<8x128xf32>
    tpu.vector_store %arg8[%c0_138, %c0_139], %305 {strides = array<i32>} : memref<8x128xf32, #tpu.memory_space<vmem>>, vector<8x128xf32>,
    %c8_i32_140 = arith.constant 8 : i32
    %c0_141 = arith.constant 0 : index
    %c0_142 = arith.constant 0 : index
    %307 = vector.load %arg8[%c0_141, %c0_142] : memref<8x128xf32, #tpu.memory_space<vmem>>, vector<8x128xf32>
    %308 = arith.truncf %307 : vector<8x128xf32> to vector<8x128xbf16>
    %c0_143 = arith.constant 0 : index
    %c0_144 = arith.constant 0 : index
    %309 = vector.load %arg4[%c0_143, %c0_144] : memref<128x128xbf16, #tpu.memory_space<vmem>>, vector<128x128xbf16>
    %cst_145 = arith.constant dense<0.000000e+00> : vector<8x128xf32>
    %310 = tpu.matmul %308, %309, %cst_145 {dimension_numbers = #tpu.dot_dimension_numbers<[1], [0], [0], [1], [0, 0, 1, 1], [], []>} : vector<8x128xbf16>, vector<128x128xbf16>, vector<8x128xf32> -> vector<8x128xf32>
    %c0_146 = arith.constant 0 : index
    %c0_147 = arith.constant 0 : index
    %311 = vector.load %arg5[%c0_146, %c0_147] : memref<1x128xf32, #tpu.memory_space<vmem>>, vector<1x128xf32>
    %312 = vector.broadcast %311 : vector<1x128xf32> to vector<8x128xf32>
    %313 = arith.addf %310, %312 : vector<8x128xf32>
    %c0_148 = arith.constant 0 : index
    %c0_149 = arith.constant 0 : index
    %314 = vector.load %arg6[%c0_148, %c0_149] : memref<8x128xf32, #tpu.memory_space<vmem>>, vector<8x128xf32>
    tpu.vector_store %arg6[%c0_148, %c0_149], %313 {strides = array<i32>} : memref<8x128xf32, #tpu.memory_space<vmem>>, vector<8x128xf32>,
    return
  }
}

</mosaic_0001>

<bundles_post_ra>
// kernel: tpu_custom_call.1
= control target key start
LH: loop header
LB: loop body
LE: loop exit
PB: predicated region body
PF: predicated region fallthrough
CT: control target
= control target key end

     0   :  { %11 = vsyncpa [#allocation6], 0  ;;  %s4604_s0 = inlined_call_operand.hbm [shape: bf16[64,128], index: 0, kind: input, shape index: {}]   ;;  %s4605_s1 = inlined_call_operand.hbm [shape: bf16[128,512], index: 1, kind: input, shape index: {}]   ;;  %s4606_s2 = inlined_call_operand.hbm [shape: bf16[128,512], index: 2, kind: input, shape index: {}]   ;;  %s4607_s3 = inlined_call_operand.vmem [shape: f32[1,512], index: 3, kind: input, shape index: {}]   ;;  %s4608_s4 = inlined_call_operand.hbm [shape: bf16[128,128], index: 4, kind: input, shape index: {}]   ;;  %s4609_s5 = inlined_call_operand.vmem [shape: f32[1,128], index: 5, kind: input, shape index: {}]   ;;  %s4610_s6 = inlined_call_operand.hbm [shape: f32[8,128], index: 6, kind: output, shape index: {}]  }
   0x1   :  { %12 = vsyncpa [#allocation9], 0 }
   0x2   :  { %13 = vsyncpa [#allocation12], 0 }
   0x3   :  { %14 = vsyncpa [#allocation7], 0  ;;  %s3925_s21 = smov [#allocation8]   ;;  %s3807_s25 = scalar_lea.hbm %s4605_s1, 4096 }
   0x4   :  { %s32_s22 = sshll.u32 %s3925_s21, 4  ;;  %p3808_p0 = scmp.ne.s32.totalorder %s4605_s1, %s3807_s25  ;;  %s33_s22 = int_to_ptr.vmem [resolvable:$true] %s32_s22 }
   0x5   :  { %p3811_p1 = scmp.lt.u32.totalorder %s3807_s25, %s4605_s1 }
   0x7   :  { %p3813_p2 = pnand %p3811_p1, %p3808_p0 }
   0x9   :  { %3816 = shalt.err (!%p3813_p2)
}
   0xa   :  { %s3817_s30 = scalar_lea.vmem %s33_s22, 4096  ;;  %p3822_p4 = scmp.lt.s32.totalorder %s33_s22, %s33_s22 }
   0xb   :  { %p3818_p3 = scmp.ne.s32.totalorder %s33_s22, %s3817_s30  ;;  %p3823_p5 = scmp.lt.s32.totalorder %s3817_s30, %s3817_s30 }
   0xd   :  { %p3824_p6 = por %p3823_p5, %p3822_p4 }
   0xf   :  { %p3825_p7 = pnand %p3824_p6, %p3818_p3 }
  0x11   :  { %3828 = shalt.err (!%p3825_p7)
}
  0x12   :  { %s3926_s7 = smov 256   ;;  %s3927_s8 = smov 16  }
  0x13   :  { %38 = dma.hbm_to_vmem [thread:$0]  %s4605_s1, 4096, %s33_s22, [#allocation9], %s3926_s7, %s3926_s7, %s3927_s8  }
  0x14   :  { %s3928_s11 = smov [#allocation5]   ;;  %s3829_s15 = scalar_lea.hbm %s4604_s0, 512 }
  0x15   :  { %s20_s12 = sshll.u32 %s3928_s11, 4  ;;  %p3830_p8 = scmp.ne.s32.totalorder %s4604_s0, %s3829_s15  ;;  %s21_s12 = int_to_ptr.vmem [resolvable:$true] %s20_s12 }
  0x16   :  { %p3833_p9 = scmp.lt.u32.totalorder %s3829_s15, %s4604_s0 }
  0x18   :  { %p3835_p10 = pnand %p3833_p9, %p3830_p8 }
  0x1a   :  { %3838 = shalt.err (!%p3835_p10)
}
  0x1b   :  { %s3839_s20 = scalar_lea.vmem %s21_s12, 512  ;;  %p3844_p12 = scmp.lt.s32.totalorder %s21_s12, %s21_s12 }
  0x1c   :  { %p3840_p11 = scmp.ne.s32.totalorder %s21_s12, %s3839_s20  ;;  %p3845_p13 = scmp.lt.s32.totalorder %s3839_s20, %s3839_s20 }
  0x1e   :  { %p3846_p0 = por %p3845_p13, %p3844_p12 }
  0x20   :  { %p3847_p1 = pnand %p3846_p0, %p3840_p11 }
  0x22   :  { %3850 = shalt.err (!%p3847_p1)
}
  0x23   :  { %s3929_s1 = smov 64   ;;  %s3930_s21 = smov 4  }
  0x24   :  { %26 = dma.hbm_to_vmem [thread:$0]  %s4604_s0, 512, %s21_s12, [#allocation6], %s3929_s1, %s3929_s1, %s3930_s21  }
  0x25   :  { %s3931_s24 = smov [#allocation10]   ;;  %s3932_s26 = smov [#allocation11]  }
  0x26   :  { %s44_s25 = sshll.u32 %s3931_s24, 4  ;;  %s58_s27 = sshll.u32 %s3932_s26, 4  ;;  %s45_s25 = int_to_ptr.vmem [resolvable:$true] %s44_s25  ;;  %s4003_s27 = int_to_ptr.vmem [resolvable:$true] %s58_s27 }
  0x27   :  { %s3851_s30 = scalar_lea.hbm %s4606_s2, 4096 }
  0x28   :  { %p3852_p2 = scmp.ne.s32.totalorder %s4606_s2, %s3851_s30  ;;  %p3855_p3 = scmp.lt.u32.totalorder %s3851_s30, %s4606_s2 }
  0x2a   :  { %p3857_p4 = pnand %p3855_p3, %p3852_p2 }
  0x2c   :  { %3860 = shalt.err (!%p3857_p4)
}
  0x2d   :  { %s3861_s0 = scalar_lea.vmem %s45_s25, 4096  ;;  %p3866_p6 = scmp.lt.s32.totalorder %s45_s25, %s45_s25 }
  0x2e   :  { %p3862_p5 = scmp.ne.s32.totalorder %s45_s25, %s3861_s0  ;;  %p3867_p7 = scmp.lt.s32.totalorder %s3861_s0, %s3861_s0 }
  0x30   :  { %p3868_p8 = por %p3867_p7, %p3866_p6 }
  0x32   :  { %p3869_p9 = pnand %p3868_p8, %p3862_p5 }
  0x34   :  { %3872 = shalt.err (!%p3869_p9)
}
  0x35   :  { %50 = dma.hbm_to_vmem [thread:$0]  %s4606_s2, 4096, %s45_s25, [#allocation9], %s3926_s7, %s3926_s7, %s3927_s8  }
  0x36   :  { %s3873_s17 = scalar_lea.hbm %s4608_s4, 1024 }
  0x37   :  { %p3874_p10 = scmp.ne.s32.totalorder %s4608_s4, %s3873_s17  ;;  %p3877_p11 = scmp.lt.u32.totalorder %s3873_s17, %s4608_s4 }
  0x39   :  { %p3879_p12 = pnand %p3877_p11, %p3874_p10 }
  0x3b   :  { %3882 = shalt.err (!%p3879_p12)
}
  0x3c   :  { %s3883_s23 = scalar_lea.vmem %s4003_s27, 1024  ;;  %p3888_p0 = scmp.lt.s32.totalorder %s4003_s27, %s4003_s27 }
  0x3d   :  { %p3884_p13 = scmp.ne.s32.totalorder %s4003_s27, %s3883_s23  ;;  %p3889_p1 = scmp.lt.s32.totalorder %s3883_s23, %s3883_s23 }
  0x3f   :  { %p3890_p2 = por %p3889_p1, %p3888_p0 }
  0x41   :  { %p3891_p3 = pnand %p3890_p2, %p3884_p13 }
  0x43   :  { %3894 = shalt.err (!%p3891_p3)
}
  0x44   :  { %64 = dma.hbm_to_vmem [thread:$0]  %s4608_s4, 1024, %s4003_s27, [#allocation12], %s3929_s1, %s3929_s1, %s3930_s21  }
  0x45   :  { %3917 = dma.done.wait [#allocation6], 512  }
  0x46   :  { %3918 = vsyncadd [#allocation6], 4294966784 }
  0x47   :  { %3919 = dma.done.wait [#allocation9], 8192  }
  0x48   :  { %3920 = vsyncadd [#allocation9], 4294959104 }
  0x49   :  { %3921 = dma.done.wait [#allocation12], 1024  }
  0x4a   :  { %3922 = vsyncadd [#allocation12], 4294966272  ;;  %v4611_v0 = vmov 0   ;;  %v3523_v1 = vld [vmem:[#allocation8 + $0x4] ss:$16 sps:$4 sm:$0xff]   ;;  %v3584_v44 = vld [vmem:[#allocation5 + $0x8] sm:$0xff]  }
  0x4b   :  { %358 = vmatprep.mubr.bf16.mxu0 %v4611_v0  ;;  %431 = vmatprep.mubr.bf16.mxu1 %v4611_v0  ;;  %v3525_v2 = vld [vmem:[#allocation8 + $0xc] ss:$16 sps:$4 sm:$0xff]   ;;  %v3527_v3 = vld [vmem:[#allocation8] ss:$16 sps:$4 sm:$0xff]   ;;  %v3528_v4 = vld [vmem:[#allocation8 + $0x8] ss:$16 sps:$4 sm:$0xff]  }
  0x4c   :  { %326 = vmatprep.subr.bf16.mxu0 %v3523_v1  ;;  %399 = vmatprep.subr.bf16.mxu1 %v3525_v2  ;;  %v3529_v5 = vld [vmem:[#allocation8 + $0x24] ss:$16 sps:$4 sm:$0xff]   ;;  %v3531_v6 = vld [vmem:[#allocation8 + $0x2c] ss:$16 sps:$4 sm:$0xff]   ;;  %v3533_v7 = vld [vmem:[#allocation8 + $0x20] ss:$16 sps:$4 sm:$0xff]  }
  0x4d   :  { %327 = vmatpush1.bf16.msra.mxu0 %v3527_v3  ;;  %400 = vmatpush1.bf16.msra.mxu1 %v3528_v4  ;;  %v3534_v8 = vld [vmem:[#allocation8 + $0x28] ss:$16 sps:$4 sm:$0xff]   ;;  %v3535_v9 = vld [vmem:[#allocation8 + $0x44] ss:$16 sps:$4 sm:$0xff]   ;;  %v3537_v10 = vld [vmem:[#allocation8 + $0x4c] ss:$16 sps:$4 sm:$0xff]  }
  0x4e   :  { %328 = vmatprep.subr.bf16.mxu0 %v3529_v5  ;;  %401 = vmatprep.subr.bf16.mxu1 %v3531_v6  ;;  %v3539_v11 = vld [vmem:[#allocation8 + $0x40] ss:$16 sps:$4 sm:$0xff]   ;;  %v3540_v12 = vld [vmem:[#allocation8 + $0x48] ss:$16 sps:$4 sm:$0xff]   ;;  %v3541_v13 = vld [vmem:[#allocation8 + $0x64] ss:$16 sps:$4 sm:$0xff]  }
  0x4f   :  { %v3543_v14 = vld [vmem:[#allocation8 + $0x6c] ss:$16 sps:$4 sm:$0xff]   ;;  %v3545_v15 = vld [vmem:[#allocation8 + $0x60] ss:$16 sps:$4 sm:$0xff]   ;;  %v3546_v16 = vld [vmem:[#allocation8 + $0x68] ss:$16 sps:$4 sm:$0xff]  }
  0x50   :  { %v3547_v17 = vld [vmem:[#allocation8 + $0x84] ss:$16 sps:$4 sm:$0xff]   ;;  %v3549_v18 = vld [vmem:[#allocation8 + $0x8c] ss:$16 sps:$4 sm:$0xff]   ;;  %v3551_v19 = vld [vmem:[#allocation8 + $0x80] ss:$16 sps:$4 sm:$0xff]  }
  0x51   :  { %329 = vmatpush1.bf16.msra.mxu0 %v3533_v7  ;;  %402 = vmatpush1.bf16.msra.mxu1 %v3534_v8  ;;  %v3552_v20 = vld [vmem:[#allocation8 + $0x88] ss:$16 sps:$4 sm:$0xff]   ;;  %v3553_v21 = vld [vmem:[#allocation8 + $0xa4] ss:$16 sps:$4 sm:$0xff]   ;;  %v3555_v22 = vld [vmem:[#allocation8 + $0xac] ss:$16 sps:$4 sm:$0xff]   ;;  %v122_v7 = vlaneseq }
  0x52   :  { %330 = vmatprep.subr.bf16.mxu0 %v3535_v9  ;;  %403 = vmatprep.subr.bf16.mxu1 %v3537_v10  ;;  %v3557_v23 = vld [vmem:[#allocation8 + $0xa0] ss:$16 sps:$4 sm:$0xff]   ;;  %v3558_v24 = vld [vmem:[#allocation8 + $0xa8] ss:$16 sps:$4 sm:$0xff]   ;;  %v3559_v25 = vld [vmem:[#allocation8 + $0xc4] ss:$16 sps:$4 sm:$0xff]  }
  0x53   :  { %v3561_v26 = vld [vmem:[#allocation8 + $0xcc] ss:$16 sps:$4 sm:$0xff]   ;;  %v3563_v27 = vld [vmem:[#allocation8 + $0xc0] ss:$16 sps:$4 sm:$0xff]   ;;  %v3564_v28 = vld [vmem:[#allocation8 + $0xc8] ss:$16 sps:$4 sm:$0xff]  }
  0x54   :  { %v3565_v29 = vld [vmem:[#allocation8 + $0xe4] ss:$16 sps:$4 sm:$0xff]   ;;  %v3567_v30 = vld [vmem:[#allocation8 + $0xec] ss:$16 sps:$4 sm:$0xff]   ;;  %v3569_v31 = vld [vmem:[#allocation8 + $0xe0] ss:$16 sps:$4 sm:$0xff]  }
  0x55   :  { %331 = vmatpush1.bf16.msra.mxu0 %v3539_v11  ;;  %404 = vmatpush1.bf16.msra.mxu1 %v3540_v12  ;;  %v3570_v32 = vld [vmem:[#allocation8 + $0xe8] ss:$16 sps:$4 sm:$0xff]   ;;  %v4042_v33 = vld [vmem:[#allocation10 + $0x4] ss:$16 sps:$4 sm:$0xff]   ;;  %v4044_v34 = vld [vmem:[#allocation10 + $0xc] ss:$16 sps:$4 sm:$0xff]  }
  0x56   :  { %332 = vmatprep.subr.bf16.mxu0 %v3541_v13  ;;  %405 = vmatprep.subr.bf16.mxu1 %v3543_v14  ;;  %v3571_v35 = vld [vmem:[#allocation5] sm:$0xff]   ;;  %v4048_v37 = vld [vmem:[#allocation10 + $0x8] ss:$16 sps:$4 sm:$0xff]   ;;  %v4054_v39 = vld [vmem:[#allocation10 + $0x2c] ss:$16 sps:$4 sm:$0xff]   ;;  %v3934_v6 = vmov 0.0|0.0  }
  0x57   :  { %v4046_v36 = vld [vmem:[#allocation10] ss:$16 sps:$4 sm:$0xff]   ;;  %v4052_v38 = vld [vmem:[#allocation10 + $0x24] ss:$16 sps:$4 sm:$0xff]   ;;  %v4060_v41 = vld [vmem:[#allocation10 + $0x28] ss:$16 sps:$4 sm:$0xff]  }
  0x58   :  { %v4056_v40 = vld [vmem:[#allocation10 + $0x20] ss:$16 sps:$4 sm:$0xff]   ;;  %v4064_v42 = vld [vmem:[#allocation10 + $0x44] ss:$16 sps:$4 sm:$0xff]   ;;  %v4066_v43 = vld [vmem:[#allocation10 + $0x4c] ss:$16 sps:$4 sm:$0xff]  }
  0x59   :  { %333 = vmatpush1.bf16.msra.mxu0 %v3545_v15  ;;  %406 = vmatpush1.bf16.msra.mxu1 %v3546_v16  ;;  %v4070_v45 = vld [vmem:[#allocation10 + $0x40] ss:$16 sps:$4 sm:$0xff]   ;;  %v4072_v46 = vld [vmem:[#allocation10 + $0x48] ss:$16 sps:$4 sm:$0xff]   ;;  %v4076_v47 = vld [vmem:[#allocation10 + $0x64] ss:$16 sps:$4 sm:$0xff]  }
  0x5a   :  { %334 = vmatprep.subr.bf16.mxu0 %v3547_v17  ;;  %407 = vmatprep.subr.bf16.mxu1 %v3549_v18  ;;  %v4080_v48 = vld [vmem:[#allocation10 + $0x6c] ss:$16 sps:$4 sm:$0xff]   ;;  %v4082_v49 = vld [vmem:[#allocation10 + $0x60] ss:$16 sps:$4 sm:$0xff]   ;;  %v4084_v50 = vld [vmem:[#allocation10 + $0x68] ss:$16 sps:$4 sm:$0xff]  }
  0x5b   :  { %v4088_v51 = vld [vmem:[#allocation10 + $0x84] ss:$16 sps:$4 sm:$0xff]   ;;  %v4092_v52 = vld [vmem:[#allocation10 + $0x8c] ss:$16 sps:$4 sm:$0xff]   ;;  %v4096_v54 = vld [vmem:[#allocation10 + $0x80] ss:$16 sps:$4 sm:$0xff]  }
  0x5c   :  { %v3597_v53 = vld [vmem:[#allocation5 + $0x10] sm:$0xff]   ;;  %v4098_v55 = vld [vmem:[#allocation10 + $0x88] ss:$16 sps:$4 sm:$0xff]   ;;  %v4102_v57 = vld [vmem:[#allocation10 + $0xac] ss:$16 sps:$4 sm:$0xff]   ;;  %v123_v8 = vshrl.u32 %v122_v7, 7 }
  0x5d   :  { %335 = vmatpush1.bf16.msra.mxu0 %v3551_v19  ;;  %408 = vmatpush1.bf16.msra.mxu1 %v3552_v20  ;;  %v4100_v56 = vld [vmem:[#allocation10 + $0xa4] ss:$16 sps:$4 sm:$0xff]   ;;  %v4108_v58 = vld [vmem:[#allocation10 + $0xa0] ss:$16 sps:$4 sm:$0xff]   ;;  %v4110_v59 = vld [vmem:[#allocation10 + $0xa8] ss:$16 sps:$4 sm:$0xff]  }
  0x5e   :  { %336 = vmatprep.subr.bf16.mxu0 %v3553_v21  ;;  %409 = vmatprep.subr.bf16.mxu1 %v3555_v22  ;;  %v4112_v60 = vld [vmem:[#allocation10 + $0xc4] ss:$16 sps:$4 sm:$0xff]   ;;  %v4114_v61 = vld [vmem:[#allocation10 + $0xcc] ss:$16 sps:$4 sm:$0xff]   ;;  %v4122_v63 = vld [vmem:[#allocation10 + $0xc0] ss:$16 sps:$4 sm:$0xff]  }
  0x5f   :  { %v3610_v62 = vld [vmem:[#allocation5 + $0x18] sm:$0xff]   ;;  %v4126_v2 = vld [vmem:[#allocation10 + $0xe4] ss:$16 sps:$4 sm:$0xff]   ;;  %v4134_v4 = vld [vmem:[#allocation10 + $0xe0] ss:$16 sps:$4 sm:$0xff]   ;;  %v132_v9 = vsub.s32 2, %v123_v8 }
  0x60   :  { %v4124_v1 = vld [vmem:[#allocation10 + $0xc8] ss:$16 sps:$4 sm:$0xff]   ;;  %v4128_v3 = vld [vmem:[#allocation10 + $0xec] ss:$16 sps:$4 sm:$0xff]   ;;  %v136_v10 = vsub.s32 3, %v123_v8  ;;  %v124_v11 = vsub.s32 0, %v123_v8 }
  0x61   :  { %337 = vmatpush1.bf16.msra.mxu0 %v3557_v23  ;;  %410 = vmatpush1.bf16.msra.mxu1 %v3558_v24  ;;  %v4136_v5 = vld [vmem:[#allocation10 + $0xe8] ss:$16 sps:$4 sm:$0xff]   ;;  %v120_v12 = vld [vmem:[%s4607_s3] sm:$0xf]  ;;  %v128_v13 = vsub.s32 1, %v123_v8  ;;  %vm3936_vm0 = vmmov 0  }
  0x62   :  { %338 = vmatprep.subr.bf16.mxu0 %v3559_v25  ;;  %411 = vmatprep.subr.bf16.mxu1 %v3561_v26  ;;  %v4185_v14 = vrot.slane %v120_v12, %v132_v9  ;;  %v4191_v17 = vrot.slane %v120_v12, %v136_v10  ;;  %v125_v18 = vrot.slane %v120_v12, %v124_v11  ;;  %s3937_s21 = smov [#allocation13]  }
  0x63   :  { %v129_v21 = vrot.slane %v120_v12, %v128_v13  ;;  %s3138_s24 = sshll.u32 %s3937_s21, 4  ;;  %s3139_s24 = int_to_ptr.vmem [resolvable:$true] %s3138_s24 }
  0x64   :  { %s3895_s25 = scalar_lea.vmem %s3139_s24, 128  ;;  %p3900_p5 = scmp.lt.s32.totalorder %s3139_s24, %s3139_s24 }
  0x65   :  { %339 = vmatpush1.bf16.msra.mxu0 %v3563_v27  ;;  %412 = vmatpush1.bf16.msra.mxu1 %v3564_v28  ;;  %p3896_p4 = scmp.ne.s32.totalorder %s3139_s24, %s3895_s25  ;;  %p3901_p6 = scmp.lt.s32.totalorder %s3895_s25, %s3895_s25 }
  0x66   :  { %340 = vmatprep.subr.bf16.mxu0 %v3565_v29  ;;  %413 = vmatprep.subr.bf16.mxu1 %v3567_v30 }
  0x67   :  { %p3902_p7 = por %p3901_p6, %p3900_p5 }
  0x69   :  { %341 = vmatpush1.bf16.msra.mxu0 %v3569_v31  ;;  %414 = vmatpush1.bf16.msra.mxu1 %v3570_v32  ;;  %p3903_p8 = pnand %p3902_p7, %p3896_p4 }
  0x6a   :  { %707 = vmatprep.subr.bf16.mxu0 %v4042_v33  ;;  %748 = vmatprep.subr.bf16.mxu1 %v4044_v34 }
  0x6c   :  { %359 = vmatmul.mubr.bf16.vlgmr.msra.gmra.mrb[0].mxu0 %v3571_v35  ;;  %432 = vmatmul.mubr.bf16.vlgmr.msra.gmra.mrb[0].mxu1 %v3571_v35 }
  0x6d   :  { %708 = vmatpush1.bf16.msra.mxu0 %v4046_v36  ;;  %749 = vmatpush1.bf16.msra.mxu1 %v4048_v37 }
  0x6e   :  { %709 = vmatprep.subr.bf16.mxu0 %v4052_v38  ;;  %750 = vmatprep.subr.bf16.mxu1 %v4054_v39 }
  0x6f   :  { %368 = vmatprep.mubr.bf16.mxu0 %v4611_v0  ;;  %441 = vmatprep.mubr.bf16.mxu1 %v4611_v0 }
  0x71   :  { %710 = vmatpush1.bf16.msra.mxu0 %v4056_v40  ;;  %751 = vmatpush1.bf16.msra.mxu1 %v4060_v41 }
  0x72   :  { %711 = vmatprep.subr.bf16.mxu0 %v4064_v42  ;;  %752 = vmatprep.subr.bf16.mxu1 %v4066_v43 }
  0x74   :  { %369 = vmatmul.mubr.bf16.gmra.mrb[4].mxu0 %v3584_v44  ;;  %442 = vmatmul.mubr.bf16.gmra.mrb[4].mxu1 %v3584_v44 }
  0x75   :  { %712 = vmatpush1.bf16.msra.mxu0 %v4070_v45  ;;  %753 = vmatpush1.bf16.msra.mxu1 %v4072_v46 }
  0x76   :  { %713 = vmatprep.subr.bf16.mxu0 %v4076_v47  ;;  %754 = vmatprep.subr.bf16.mxu1 %v4080_v48 }
  0x77   :  { %378 = vmatprep.mubr.bf16.mxu0 %v4611_v0  ;;  %451 = vmatprep.mubr.bf16.mxu1 %v4611_v0 }
  0x79   :  { %714 = vmatpush1.bf16.msra.mxu0 %v4082_v49  ;;  %755 = vmatpush1.bf16.msra.mxu1 %v4084_v50 }
  0x7a   :  { %715 = vmatprep.subr.bf16.mxu0 %v4088_v51  ;;  %756 = vmatprep.subr.bf16.mxu1 %v4092_v52 }
  0x7c   :  { %379 = vmatmul.mubr.bf16.gmra.mrb[8].mxu0 %v3597_v53  ;;  %452 = vmatmul.mubr.bf16.gmra.mrb[8].mxu1 %v3597_v53 }
  0x7d   :  { %716 = vmatpush1.bf16.msra.mxu0 %v4096_v54  ;;  %757 = vmatpush1.bf16.msra.mxu1 %v4098_v55 }
  0x7e   :  { %717 = vmatprep.subr.bf16.mxu0 %v4100_v56  ;;  %758 = vmatprep.subr.bf16.mxu1 %v4102_v57 }
  0x7f   :  { %388 = vmatprep.mubr.bf16.mxu0 %v4611_v0  ;;  %461 = vmatprep.mubr.bf16.mxu1 %v4611_v0 }
  0x81   :  { %718 = vmatpush1.bf16.msra.mxu0 %v4108_v58  ;;  %759 = vmatpush1.bf16.msra.mxu1 %v4110_v59 }
  0x82   :  { %719 = vmatprep.subr.bf16.mxu0 %v4112_v60  ;;  %760 = vmatprep.subr.bf16.mxu1 %v4114_v61 }
  0x84   :  { %389 = vmatmul.mubr.bf16.gmra.mrb[12].mxu0 %v3610_v62  ;;  %462 = vmatmul.mubr.bf16.gmra.mrb[12].mxu1 %v3610_v62 }
  0x85   :  { %720 = vmatpush1.bf16.msra.mxu0 %v4122_v63  ;;  %761 = vmatpush1.bf16.msra.mxu1 %v4124_v1 }
  0x86   :  { %721 = vmatprep.subr.bf16.mxu0 %v4126_v2  ;;  %762 = vmatprep.subr.bf16.mxu1 %v4128_v3 }
  0x87   :  { %739 = vmatprep.mubr.bf16.mxu0 %v4611_v0  ;;  %780 = vmatprep.mubr.bf16.mxu1 %v4611_v0 }
  0x89   :  { %722 = vmatpush1.bf16.msra.mxu0 %v4134_v4  ;;  %763 = vmatpush1.bf16.msra.mxu1 %v4136_v5 }
  0x8a   :  { %1021 = vmatprep.subr.bf16.mxu0 %v4042_v33  ;;  %1062 = vmatprep.subr.bf16.mxu1 %v4044_v34 }
  0x8c   :  { %740 = vmatmul.mubr.bf16.vlgmr.msra.gmra.mrb[16].mxu0 %v3934_v6  ;;  %781 = vmatmul.mubr.bf16.vlgmr.msra.gmra.mrb[16].mxu1 %v3934_v6 }
  0x8d   :  { %1022 = vmatpush1.bf16.msra.mxu0 %v4046_v36  ;;  %1063 = vmatpush1.bf16.msra.mxu1 %v4048_v37 }
  0x8e   :  { %1023 = vmatprep.subr.bf16.mxu0 %v4052_v38  ;;  %1064 = vmatprep.subr.bf16.mxu1 %v4054_v39 }
  0x8f   :  { %1053 = vmatprep.mubr.bf16.mxu0 %v4611_v0  ;;  %1094 = vmatprep.mubr.bf16.mxu1 %v4611_v0 }
  0x91   :  { %1024 = vmatpush1.bf16.msra.mxu0 %v4056_v40  ;;  %1065 = vmatpush1.bf16.msra.mxu1 %v4060_v41 }
  0x92   :  { %1025 = vmatprep.subr.bf16.mxu0 %v4064_v42  ;;  %1066 = vmatprep.subr.bf16.mxu1 %v4066_v43 }
  0x95   :  { %1026 = vmatpush1.bf16.msra.mxu0 %v4070_v45  ;;  %1067 = vmatpush1.bf16.msra.mxu1 %v4072_v46 }
  0x96   :  { %1027 = vmatprep.subr.bf16.mxu0 %v4076_v47  ;;  %1068 = vmatprep.subr.bf16.mxu1 %v4080_v48 }
  0x99   :  { %1028 = vmatpush1.bf16.msra.mxu0 %v4082_v49  ;;  %1069 = vmatpush1.bf16.msra.mxu1 %v4084_v50 }
  0x9a   :  { %1029 = vmatprep.subr.bf16.mxu0 %v4088_v51  ;;  %1070 = vmatprep.subr.bf16.mxu1 %v4092_v52 }
  0x9d   :  { %1030 = vmatpush1.bf16.msra.mxu0 %v4096_v54  ;;  %1071 = vmatpush1.bf16.msra.mxu1 %v4098_v55 }
  0x9e   :  { %1031 = vmatprep.subr.bf16.mxu0 %v4100_v56  ;;  %1072 = vmatprep.subr.bf16.mxu1 %v4102_v57 }
  0xa1   :  { %1032 = vmatpush1.bf16.msra.mxu0 %v4108_v58  ;;  %1073 = vmatpush1.bf16.msra.mxu1 %v4110_v59 }
  0xa2   :  { %1033 = vmatprep.subr.bf16.mxu0 %v4112_v60  ;;  %1074 = vmatprep.subr.bf16.mxu1 %v4114_v61 }
  0xa5   :  { %1034 = vmatpush1.bf16.msra.mxu0 %v4122_v63  ;;  %1075 = vmatpush1.bf16.msra.mxu1 %v4124_v1 }
  0xa6   :  { %1035 = vmatprep.subr.bf16.mxu0 %v4126_v2  ;;  %1076 = vmatprep.subr.bf16.mxu1 %v4128_v3 }
  0xa9   :  { %1036 = vmatpush1.bf16.msra.mxu0 %v4134_v4  ;;  %1077 = vmatpush1.bf16.msra.mxu1 %v4136_v5 }
  0xaa   :  { %1335 = vmatprep.subr.bf16.mxu0 %v4042_v33  ;;  %1376 = vmatprep.subr.bf16.mxu1 %v4044_v34 }
 0x13f   :  { %v4187_v15 = vpop.f32.mrb[0].mxu0  ;;  %v4189_v16 = vpop.f32.mrb[0].mxu1 }
 0x140   :  { %v362_v19 = vpop.f32.mrb[1].mxu0  ;;  %v435_v20 = vpop.f32.mrb[1].mxu1 }
 0x141   :  { %v364_v22 = vpop.f32.mrb[2].mxu0  ;;  %v437_v23 = vpop.f32.mrb[2].mxu1 }
 0x142   :  { %v4193_v24 = vadd.f32 %v364_v22, %v125_v18  ;;  %v366_v25 = vpop.f32.mrb[3].mxu0  ;;  %v4196_v26 = vadd.f32 %v437_v23, %v4185_v14  ;;  %v439_v27 = vpop.f32.mrb[3].mxu1 }
 0x143   :  { %v4198_v28 = vadd.f32 %v366_v25, %v129_v21  ;;  %v4201_v29 = vadd.f32 %v439_v27, %v4191_v17 }
 0x147   :  { %v370_v30 = vpop.f32.mrb[4].mxu0  ;;  %v443_v31 = vpop.f32.mrb[4].mxu1 }
 0x148   :  { %v4203_v32 = vadd.f32 %v370_v30, %v125_v18  ;;  %v372_v35 = vpop.f32.mrb[5].mxu0  ;;  %v4206_v44 = vadd.f32 %v443_v31, %v4185_v14  ;;  %v445_v53 = vpop.f32.mrb[5].mxu1 }
 0x149   :  { %v4208_v62 = vadd.f32 %v372_v35, %v129_v21  ;;  %v374_v6 = vpop.f32.mrb[6].mxu0  ;;  %v4211_v7 = vadd.f32 %v445_v53, %v4191_v17  ;;  %v447_v8 = vpop.f32.mrb[6].mxu1 }
 0x14a   :  { %v4213_v9 = vadd.f32 %v374_v6, %v125_v18  ;;  %v376_v10 = vpop.f32.mrb[7].mxu0  ;;  %v4216_v11 = vadd.f32 %v447_v8, %v4185_v14  ;;  %v449_v12 = vpop.f32.mrb[7].mxu1 }
 0x14b   :  { %4613 = vst [vmem:[#allocation18_spill] sm:$0xff] %v4211_v7  ;;  %v4218_v13 = vadd.f32 %v376_v10, %v129_v21  ;;  %v4221_v22 = vadd.f32 %v449_v12, %v4191_v17 }
 0x14c   :  { %4614 = vst [vmem:[#allocation19_spill] sm:$0xff] %v4213_v9  ;;  %4615 = vst [vmem:[#allocation20_spill] sm:$0xff] %v4216_v11 }
 0x14d   :  { %4616 = vst [vmem:[#allocation21_spill] sm:$0xff] %v4218_v13  ;;  %4617 = vst [vmem:[#allocation22_spill] sm:$0xff] %v4221_v22 }
 0x14f   :  { %v380_v23 = vpop.f32.mrb[8].mxu0  ;;  %v453_v25 = vpop.f32.mrb[8].mxu1 }
 0x150   :  { %v4223_v27 = vadd.f32 %v380_v23, %v125_v18  ;;  %v382_v30 = vpop.f32.mrb[9].mxu0  ;;  %v4226_v31 = vadd.f32 %v453_v25, %v4185_v14  ;;  %v455_v35 = vpop.f32.mrb[9].mxu1 }
 0x151   :  { %v4228_v53 = vadd.f32 %v382_v30, %v129_v21  ;;  %v384_v6 = vpop.f32.mrb[10].mxu0  ;;  %v4231_v8 = vadd.f32 %v455_v35, %v4191_v17  ;;  %v457_v10 = vpop.f32.mrb[10].mxu1 }
 0x152   :  { %4618 = vst [vmem:[#allocation23_spill] sm:$0xff] %v4223_v27  ;;  %4619 = vst [vmem:[#allocation24_spill] sm:$0xff] %v4226_v31  ;;  %v4233_v0 = vadd.f32 %v384_v6, %v125_v18  ;;  %v386_v12 = vpop.f32.mrb[11].mxu0  ;;  %v4236_v22 = vadd.f32 %v457_v10, %v4185_v14  ;;  %v459_v23 = vpop.f32.mrb[11].mxu1 }
 0x153   :  { %4620 = vst [vmem:[#allocation25_spill] sm:$0xff] %v4228_v53  ;;  %4621 = vst [vmem:[#allocation26_spill] sm:$0xff] %v4231_v8  ;;  %v4238_v27 = vadd.f32 %v386_v12, %v129_v21  ;;  %v4241_v25 = vadd.f32 %v459_v23, %v4191_v17 }
 0x154   :  { %4622 = vst [vmem:[#allocation27_spill] sm:$0xff] %v4233_v0  ;;  %4623 = vst [vmem:[#allocation28_spill] sm:$0xff] %v4236_v22 }
 0x155   :  { %4624 = vst [vmem:[#allocation29_spill] sm:$0xff] %v4238_v27  ;;  %4625 = vst [vmem:[#allocation30_spill] sm:$0xff] %v4241_v25 }
 0x157   :  { %v390_v31 = vpop.f32.mrb[12].mxu0  ;;  %v463_v30 = vpop.f32.mrb[12].mxu1 }
 0x158   :  { %v4243_v53 = vadd.f32 %v390_v31, %v125_v18  ;;  %v392_v13 = vpop.f32.mrb[13].mxu0  ;;  %v4246_v35 = vadd.f32 %v463_v30, %v4185_v14  ;;  %v465_v6 = vpop.f32.mrb[13].mxu1 }
 0x159   :  { %v4248_v0 = vadd.f32 %v392_v13, %v129_v21  ;;  %v394_v8 = vpop.f32.mrb[14].mxu0  ;;  %v4251_v10 = vadd.f32 %v465_v6, %v4191_v17  ;;  %v467_v12 = vpop.f32.mrb[14].mxu1  ;;  %v361_v13 = vadd.f32 %v4187_v15, %v125_v18  ;;  %v363_v6 = vadd.f32 %v362_v19, %v129_v21 }
 0x15a   :  { %4626 = vst [vmem:[#allocation31_spill] sm:$0xff] %v4243_v53  ;;  %4627 = vst [vmem:[#allocation32_spill] sm:$0xff] %v4246_v35  ;;  %v4253_v27 = vadd.f32 %v394_v8, %v125_v18  ;;  %v396_v23 = vpop.f32.mrb[15].mxu0  ;;  %v4256_v25 = vadd.f32 %v467_v12, %v4185_v14  ;;  %v469_v31 = vpop.f32.mrb[15].mxu1 }
 0x15b   :  { %4628 = vst [vmem:[#allocation33_spill] sm:$0xff] %v4248_v0  ;;  %4629 = vst [vmem:[#allocation34_spill] sm:$0xff] %v4251_v10  ;;  %v4258_v53 = vadd.f32 %v396_v23, %v129_v21  ;;  %v4261_v30 = vadd.f32 %v469_v31, %v4191_v17  ;;  %v434_v0 = vadd.f32 %v4189_v16, %v4185_v14 }
 0x15c   :  { %4630 = vst [vmem:[#allocation35_spill] sm:$0xff] %v4253_v27  ;;  %4631 = vst [vmem:[#allocation36_spill] sm:$0xff] %v4256_v25  ;;  %v436_v10 = vadd.f32 %v435_v20, %v4191_v17 }
 0x15d   :  { %4632 = vst [vmem:[#allocation37_spill] sm:$0xff] %v4258_v53  ;;  %4633 = vst [vmem:[#allocation38_spill] sm:$0xff] %v4261_v30 }
 0x15f   :  { %v741_v8 = vpop.f32.mrb[16].mxu0  ;;  %v782_v27 = vpop.f32.mrb[16].mxu1 }
 0x160   :  { %v789_v35 = vadd.f32 %v741_v8, %v361_v13  ;;  %v791_v22 = vadd.f32 %v782_v27, %v434_v0  ;;  %v743_v12 = vpop.f32.mrb[17].mxu0  ;;  %v784_v25 = vpop.f32.mrb[17].mxu1 }
 0x161   :  { %v790_v11 = vadd.f32 %v743_v12, %v363_v6  ;;  %v792_v23 = vadd.f32 %v784_v25, %v436_v10  ;;  %v745_v53 = vpop.f32.mrb[18].mxu0  ;;  %v786_v9 = vpop.f32.mrb[18].mxu1 }
 0x162   :  { %v3224_v31 = vmul.f32 -1.442695, %v789_v35  ;;  %v746_v30 = vpop.f32.mrb[19].mxu0  ;;  %v787_v7 = vpop.f32.mrb[19].mxu1 }
 0x163   :  { %v3225_v15 = vmul.f32 -1.442695, %v790_v11  ;;  %v3226_v14 = vmul.f32 -1.442695, %v792_v23 }
 0x164   :  { %3679 = vpow2.f32 %v3224_v31 }
 0x165   :  { %3681 = vpow2.f32 %v3225_v15 }
 0x166   :  { %3683 = vpow2.f32 %v3226_v14 }
 0x167   :  { %3685 = vtanh.f32 %v791_v22  ;;  %v4634_v22 = vmov 0  }
 0x16e   :  { %v3680_v16 = vpop.eup %3679 }
 0x16f   :  { %v3682_v18 = vpop.eup %3681  ;;  %v796_v17 = vadd.f32 1.0, %v3680_v16 }
 0x170   :  { %v802_v19 = vadd.f32 1.0, %v3682_v18  ;;  %v3684_v0 = vpop.eup %3683 }
 0x171   :  { %3687 = vrcp.f32 %v796_v17  ;;  %v3686_v20 = vpop.eup %3685  ;;  %v809_v53 = vadd.f32 1.0, %v3684_v0 }
 0x172   :  { %3689 = vrcp.f32 %v802_v19 }
 0x173   :  { %3691 = vrcp.f32 %v809_v53 }
 0x17b   :  { %v3688_v21 = vpop.eup %3687 }
 0x17c   :  { %v3690_v27 = vpop.eup %3689  ;;  %v814_v9 = vmul.f32 %v3688_v21, %v3686_v20 }
 0x17d   :  { %v813_v25 = vmul.f32 0.0, %v3690_v27  ;;  %v3692_v11 = vpop.eup %3691 }
 0x17f   :  { %v4267_v7 = vadd.f32 %v814_v9, %v813_v25 }
 0x181   :  { %3693 = vtanh.f32 %v4267_v7 }
 0x18b   :  { %v3694_v35 = vpop.eup %3693 }
 0x18c   :  { %v818_v10 = vmul.f32 %v3694_v35, %v3692_v11 }
 0x18e   :  { %v828_v30 = vpack.c.bf16 %v818_v10, %v818_v10 }
 0x190   :  { %1054 = vmatmul.mubr.bf16.vlgmr.msra.gmra.mrb[20].mxu0 %v828_v30  ;;  %1095 = vmatmul.mubr.bf16.vlgmr.msra.gmra.mrb[20].mxu1 %v828_v30 }
 0x191   :  { %1336 = vmatpush1.bf16.msra.mxu0 %v4046_v36  ;;  %1377 = vmatpush1.bf16.msra.mxu1 %v4048_v37 }
 0x192   :  { %1337 = vmatprep.subr.bf16.mxu0 %v4052_v38  ;;  %1378 = vmatprep.subr.bf16.mxu1 %v4054_v39 }
 0x193   :  { %1367 = vmatprep.mubr.bf16.mxu0 %v4634_v22  ;;  %1408 = vmatprep.mubr.bf16.mxu1 %v4634_v22 }
 0x195   :  { %1338 = vmatpush1.bf16.msra.mxu0 %v4056_v40  ;;  %1379 = vmatpush1.bf16.msra.mxu1 %v4060_v41 }
 0x196   :  { %1339 = vmatprep.subr.bf16.mxu0 %v4064_v42  ;;  %1380 = vmatprep.subr.bf16.mxu1 %v4066_v43 }
 0x199   :  { %1340 = vmatpush1.bf16.msra.mxu0 %v4070_v45  ;;  %1381 = vmatpush1.bf16.msra.mxu1 %v4072_v46 }
 0x19a   :  { %1341 = vmatprep.subr.bf16.mxu0 %v4076_v47  ;;  %1382 = vmatprep.subr.bf16.mxu1 %v4080_v48 }
 0x19d   :  { %1342 = vmatpush1.bf16.msra.mxu0 %v4082_v49  ;;  %1383 = vmatpush1.bf16.msra.mxu1 %v4084_v50 }
 0x19e   :  { %1343 = vmatprep.subr.bf16.mxu0 %v4088_v51  ;;  %1384 = vmatprep.subr.bf16.mxu1 %v4092_v52 }
 0x1a1   :  { %1344 = vmatpush1.bf16.msra.mxu0 %v4096_v54  ;;  %1385 = vmatpush1.bf16.msra.mxu1 %v4098_v55 }
 0x1a2   :  { %1345 = vmatprep.subr.bf16.mxu0 %v4100_v56  ;;  %1386 = vmatprep.subr.bf16.mxu1 %v4102_v57 }
 0x1a5   :  { %1346 = vmatpush1.bf16.msra.mxu0 %v4108_v58  ;;  %1387 = vmatpush1.bf16.msra.mxu1 %v4110_v59 }
 0x1a6   :  { %1347 = vmatprep.subr.bf16.mxu0 %v4112_v60  ;;  %1388 = vmatprep.subr.bf16.mxu1 %v4114_v61 }
 0x1a9   :  { %1348 = vmatpush1.bf16.msra.mxu0 %v4122_v63  ;;  %1389 = vmatpush1.bf16.msra.mxu1 %v4124_v1 }
 0x1aa   :  { %1349 = vmatprep.subr.bf16.mxu0 %v4126_v2  ;;  %1390 = vmatprep.subr.bf16.mxu1 %v4128_v3 }
 0x1ad   :  { %1350 = vmatpush1.bf16.msra.mxu0 %v4134_v4  ;;  %1391 = vmatpush1.bf16.msra.mxu1 %v4136_v5 }
 0x1ae   :  { %1649 = vmatprep.subr.bf16.mxu0 %v4042_v33  ;;  %1690 = vmatprep.subr.bf16.mxu1 %v4044_v34 }
 0x263   :  { %v1055_v13 = vpop.f32.mrb[20].mxu0  ;;  %v1096_v6 = vpop.f32.mrb[20].mxu1 }
 0x264   :  { %v1103_v8 = vadd.f32 %v1055_v13, %v4193_v24  ;;  %v1105_v12 = vadd.f32 %v1096_v6, %v4196_v26  ;;  %v1057_v23 = vpop.f32.mrb[21].mxu0  ;;  %v1098_v31 = vpop.f32.mrb[21].mxu1 }
 0x265   :  { %v1104_v15 = vadd.f32 %v1057_v23, %v4198_v28  ;;  %v1106_v14 = vadd.f32 %v1098_v31, %v4201_v29  ;;  %v1059_v16 = vpop.f32.mrb[22].mxu0  ;;  %v1100_v18 = vpop.f32.mrb[22].mxu1  ;;  %v4366_v23 = vld [vmem:[#allocation10 + $0x24] ss:$16 sps:$4 sm:$0xff]   ;;  %v4368_v31 = vld [vmem:[#allocation10 + $0x2c] ss:$16 sps:$4 sm:$0xff]  }
 0x266   :  { %v3259_v17 = vmul.f32 -1.442695, %v1103_v8  ;;  %v1060_v19 = vpop.f32.mrb[23].mxu0  ;;  %v1101_v0 = vpop.f32.mrb[23].mxu1  ;;  %v4358_v8 = vld [vmem:[#allocation10] ss:$16 sps:$4 sm:$0xff]  }
 0x267   :  { %v3260_v33 = vmul.f32 -1.442695, %v1104_v15  ;;  %v3261_v34 = vmul.f32 -1.442695, %v1106_v14  ;;  %v4370_v15 = vld [vmem:[#allocation10 + $0x20] ss:$16 sps:$4 sm:$0xff]  }
 0x268   :  { %3695 = vpow2.f32 %v3259_v17  ;;  %v4372_v14 = vld [vmem:[#allocation10 + $0x28] ss:$16 sps:$4 sm:$0xff]   ;;  %v4378_v16 = vld [vmem:[#allocation10 + $0x44] ss:$16 sps:$4 sm:$0xff]   ;;  %v4380_v18 = vld [vmem:[#allocation10 + $0x4c] ss:$16 sps:$4 sm:$0xff]  }
 0x269   :  { %3697 = vpow2.f32 %v3260_v33  ;;  %v4382_v17 = vld [vmem:[#allocation10 + $0x40] ss:$16 sps:$4 sm:$0xff]   ;;  %v4384_v19 = vld [vmem:[#allocation10 + $0x48] ss:$16 sps:$4 sm:$0xff]   ;;  %v4390_v0 = vld [vmem:[#allocation10 + $0x64] ss:$16 sps:$4 sm:$0xff]  }
 0x26a   :  { %3699 = vpow2.f32 %v3261_v34  ;;  %v4392_v33 = vld [vmem:[#allocation10 + $0x6c] ss:$16 sps:$4 sm:$0xff]   ;;  %v4394_v34 = vld [vmem:[#allocation10 + $0x60] ss:$16 sps:$4 sm:$0xff]  }
 0x26b   :  { %3701 = vtanh.f32 %v1105_v12  ;;  %v4360_v12 = vld [vmem:[#allocation10 + $0x8] ss:$16 sps:$4 sm:$0xff]  }
 0x272   :  { %v3696_v20 = vpop.eup %3695 }
 0x273   :  { %v3698_v21 = vpop.eup %3697  ;;  %v1110_v24 = vadd.f32 1.0, %v3696_v20  ;;  %v4396_v20 = vld [vmem:[#allocation10 + $0x68] ss:$16 sps:$4 sm:$0xff]  }
 0x274   :  { %v1116_v26 = vadd.f32 1.0, %v3698_v21  ;;  %v3700_v28 = vpop.eup %3699  ;;  %v4402_v21 = vld [vmem:[#allocation10 + $0x80] ss:$16 sps:$4 sm:$0xff]  }
 0x275   :  { %3703 = vrcp.f32 %v1110_v24  ;;  %v3702_v27 = vpop.eup %3701  ;;  %v1123_v25 = vadd.f32 1.0, %v3700_v28  ;;  %v4404_v24 = vld [vmem:[#allocation10 + $0x84] ss:$16 sps:$4 sm:$0xff]   ;;  %v4408_v28 = vld [vmem:[#allocation10 + $0x8c] ss:$16 sps:$4 sm:$0xff]  }
 0x276   :  { %3705 = vrcp.f32 %v1116_v26  ;;  %v4406_v26 = vld [vmem:[#allocation10 + $0x88] ss:$16 sps:$4 sm:$0xff]  }
 0x277   :  { %3707 = vrcp.f32 %v1123_v25  ;;  %v4423_v25 = vld [vmem:[#allocation10 + $0xc4] ss:$16 sps:$4 sm:$0xff]  }
 0x27f   :  { %v3704_v29 = vpop.eup %3703 }
 0x280   :  { %v3706_v9 = vpop.eup %3705  ;;  %v1128_v53 = vmul.f32 %v3704_v29, %v3702_v27  ;;  %v4410_v27 = vld [vmem:[#allocation10 + $0xa4] ss:$16 sps:$4 sm:$0xff]   ;;  %v4413_v29 = vld [vmem:[#allocation10 + $0xac] ss:$16 sps:$4 sm:$0xff]  }
 0x281   :  { %v1127_v11 = vmul.f32 %v3706_v9, %v4267_v7  ;;  %v3708_v10 = vpop.eup %3707  ;;  %v4356_v7 = vld [vmem:[#allocation10 + $0xc] ss:$16 sps:$4 sm:$0xff]   ;;  %v4417_v9 = vld [vmem:[#allocation10 + $0xa0] ss:$16 sps:$4 sm:$0xff]  }
 0x283   :  { %v4309_v35 = vadd.f32 %v1128_v53, %v1127_v11  ;;  %v4421_v53 = vld [vmem:[#allocation10 + $0xa8] ss:$16 sps:$4 sm:$0xff]   ;;  %v4426_v11 = vld [vmem:[#allocation10 + $0xcc] ss:$16 sps:$4 sm:$0xff]  }
 0x285   :  { %3709 = vtanh.f32 %v4309_v35 }
 0x28f   :  { %v3710_v30 = vpop.eup %3709 }
 0x290   :  { %v1132_v13 = vmul.f32 %v3710_v30, %v3708_v10  ;;  %v4433_v10 = vld [vmem:[#allocation10 + $0xc8] ss:$16 sps:$4 sm:$0xff]   ;;  %v4435_v30 = vld [vmem:[#allocation10 + $0xe4] ss:$16 sps:$4 sm:$0xff]  }
 0x292   :  { %v1142_v6 = vpack.c.bf16 %v1132_v13, %v1132_v13  ;;  %v4438_v13 = vld [vmem:[#allocation10 + $0xec] ss:$16 sps:$4 sm:$0xff]  }
 0x294   :  { %1368 = vmatmul.mubr.bf16.vlgmr.msra.gmra.mrb[24].mxu0 %v1142_v6  ;;  %1409 = vmatmul.mubr.bf16.vlgmr.msra.gmra.mrb[24].mxu1 %v1142_v6  ;;  %v4441_v6 = vld [vmem:[#allocation10 + $0xe0] ss:$16 sps:$4 sm:$0xff]  }
 0x295   :  { %1650 = vmatpush1.bf16.msra.mxu0 %v4046_v36  ;;  %1691 = vmatpush1.bf16.msra.mxu1 %v4048_v37 }
 0x296   :  { %1651 = vmatprep.subr.bf16.mxu0 %v4052_v38  ;;  %1692 = vmatprep.subr.bf16.mxu1 %v4054_v39 }
 0x297   :  { %1681 = vmatprep.mubr.bf16.mxu0 %v4634_v22  ;;  %1722 = vmatprep.mubr.bf16.mxu1 %v4634_v22 }
 0x299   :  { %1652 = vmatpush1.bf16.msra.mxu0 %v4056_v40  ;;  %1693 = vmatpush1.bf16.msra.mxu1 %v4060_v41 }
 0x29a   :  { %1653 = vmatprep.subr.bf16.mxu0 %v4064_v42  ;;  %1694 = vmatprep.subr.bf16.mxu1 %v4066_v43  ;;  %v4635_v43 = vld [vmem:[#allocation18_spill] sm:$0xff] }
 0x29d   :  { %1654 = vmatpush1.bf16.msra.mxu0 %v4070_v45  ;;  %1695 = vmatpush1.bf16.msra.mxu1 %v4072_v46 }
 0x29e   :  { %1655 = vmatprep.subr.bf16.mxu0 %v4076_v47  ;;  %1696 = vmatprep.subr.bf16.mxu1 %v4080_v48 }
 0x2a1   :  { %1656 = vmatpush1.bf16.msra.mxu0 %v4082_v49  ;;  %1697 = vmatpush1.bf16.msra.mxu1 %v4084_v50 }
 0x2a2   :  { %1657 = vmatprep.subr.bf16.mxu0 %v4088_v51  ;;  %1698 = vmatprep.subr.bf16.mxu1 %v4092_v52 }
 0x2a5   :  { %1658 = vmatpush1.bf16.msra.mxu0 %v4096_v54  ;;  %1699 = vmatpush1.bf16.msra.mxu1 %v4098_v55 }
 0x2a6   :  { %1659 = vmatprep.subr.bf16.mxu0 %v4100_v56  ;;  %1700 = vmatprep.subr.bf16.mxu1 %v4102_v57 }
 0x2a9   :  { %1660 = vmatpush1.bf16.msra.mxu0 %v4108_v58  ;;  %1701 = vmatpush1.bf16.msra.mxu1 %v4110_v59 }
 0x2aa   :  { %1661 = vmatprep.subr.bf16.mxu0 %v4112_v60  ;;  %1702 = vmatprep.subr.bf16.mxu1 %v4114_v61 }
 0x2ad   :  { %1662 = vmatpush1.bf16.msra.mxu0 %v4122_v63  ;;  %1703 = vmatpush1.bf16.msra.mxu1 %v4124_v1 }
 0x2ae   :  { %1663 = vmatprep.subr.bf16.mxu0 %v4126_v2  ;;  %1704 = vmatprep.subr.bf16.mxu1 %v4128_v3 }
 0x2b1   :  { %1664 = vmatpush1.bf16.msra.mxu0 %v4134_v4  ;;  %1705 = vmatpush1.bf16.msra.mxu1 %v4136_v5 }
 0x2b2   :  { %2004 = vmatprep.subr.bf16.mxu1 %v4356_v7 }
 0x367   :  { %v1369_v36 = vpop.f32.mrb[24].mxu0  ;;  %v1410_v37 = vpop.f32.mrb[24].mxu1 }
 0x368   :  { %v1417_v38 = vadd.f32 %v1369_v36, %v4203_v32  ;;  %v1419_v39 = vadd.f32 %v1410_v37, %v4206_v44  ;;  %v1371_v40 = vpop.f32.mrb[25].mxu0  ;;  %v1412_v41 = vpop.f32.mrb[25].mxu1  ;;  %v4445_v36 = vld [vmem:[#allocation10 + $0xe8] ss:$16 sps:$4 sm:$0xff]  }
 0x369   :  { %v1418_v42 = vadd.f32 %v1371_v40, %v4208_v62  ;;  %v1420_v45 = vadd.f32 %v1412_v41, %v4635_v43  ;;  %v1373_v46 = vpop.f32.mrb[26].mxu0  ;;  %v1414_v47 = vpop.f32.mrb[26].mxu1  ;;  %v4354_v62 = vld [vmem:[#allocation10 + $0x4] ss:$16 sps:$4 sm:$0xff]   ;;  %v4637_v41 = vld [vmem:[#allocation20_spill] sm:$0xff] }
 0x36a   :  { %v3294_v48 = vmul.f32 -1.442695, %v1417_v38  ;;  %v1374_v49 = vpop.f32.mrb[27].mxu0  ;;  %v1415_v50 = vpop.f32.mrb[27].mxu1  ;;  %1963 = vmatprep.subr.bf16.mxu0 %v4354_v62  ;;  %v4638_v46 = vld [vmem:[#allocation21_spill] sm:$0xff] }
 0x36b   :  { %v3295_v51 = vmul.f32 -1.442695, %v1418_v42  ;;  %v3296_v52 = vmul.f32 -1.442695, %v1420_v45 }
 0x36c   :  { %3711 = vpow2.f32 %v3294_v48  ;;  %v4639_v48 = vld [vmem:[#allocation22_spill] sm:$0xff] }
 0x36d   :  { %3713 = vpow2.f32 %v3295_v51 }
 0x36e   :  { %3715 = vpow2.f32 %v3296_v52 }
 0x36f   :  { %3717 = vtanh.f32 %v1419_v39  ;;  %v4636_v39 = vld [vmem:[#allocation19_spill] sm:$0xff] }
 0x376   :  { %v3712_v54 = vpop.eup %3711 }
 0x377   :  { %v3714_v55 = vpop.eup %3713  ;;  %v1424_v56 = vadd.f32 1.0, %v3712_v54 }
 0x378   :  { %v1430_v57 = vadd.f32 1.0, %v3714_v55  ;;  %v3716_v58 = vpop.eup %3715 }
 0x379   :  { %3719 = vrcp.f32 %v1424_v56  ;;  %v3718_v59 = vpop.eup %3717  ;;  %v1437_v1 = vadd.f32 1.0, %v3716_v58 }
 0x37a   :  { %3721 = vrcp.f32 %v1430_v57 }
 0x37b   :  { %3723 = vrcp.f32 %v1437_v1 }
 0x383   :  { %v3720_v60 = vpop.eup %3719 }
 0x384   :  { %v3722_v61 = vpop.eup %3721  ;;  %v1442_v63 = vmul.f32 %v3720_v60, %v3718_v59 }
 0x385   :  { %v1441_v2 = vmul.f32 %v3722_v61, %v4309_v35  ;;  %v3724_v4 = vpop.eup %3723  ;;  %v4429_v35 = vld [vmem:[#allocation10 + $0xc0] ss:$16 sps:$4 sm:$0xff]  }
 0x387   :  { %v4349_v3 = vadd.f32 %v1442_v63, %v1441_v2 }
 0x389   :  { %3725 = vtanh.f32 %v4349_v3 }
 0x393   :  { %v3726_v5 = vpop.eup %3725 }
 0x394   :  { %v1446_v32 = vmul.f32 %v3726_v5, %v3724_v4 }
 0x396   :  { %v1456_v44 = vpack.c.bf16 %v1446_v32, %v1446_v32 }
 0x398   :  { %1682 = vmatmul.mubr.bf16.vlgmr.msra.gmra.mrb[28].mxu0 %v1456_v44  ;;  %1723 = vmatmul.mubr.bf16.vlgmr.msra.gmra.mrb[28].mxu1 %v1456_v44 }
 0x399   :  { %1995 = vmatprep.mubr.bf16.mxu0 %v4634_v22  ;;  %2036 = vmatprep.mubr.bf16.mxu1 %v4634_v22 }
 0x39a   :  { %1964 = vmatpush1.bf16.msra.mxu0 %v4358_v8  ;;  %2005 = vmatpush1.bf16.msra.mxu1 %v4360_v12 }
 0x39b   :  { %1965 = vmatprep.subr.bf16.mxu0 %v4366_v23  ;;  %2006 = vmatprep.subr.bf16.mxu1 %v4368_v31 }
 0x39e   :  { %1966 = vmatpush1.bf16.msra.mxu0 %v4370_v15  ;;  %2007 = vmatpush1.bf16.msra.mxu1 %v4372_v14 }
 0x39f   :  { %1967 = vmatprep.subr.bf16.mxu0 %v4378_v16  ;;  %2008 = vmatprep.subr.bf16.mxu1 %v4380_v18 }
 0x3a2   :  { %1968 = vmatpush1.bf16.msra.mxu0 %v4382_v17  ;;  %2009 = vmatpush1.bf16.msra.mxu1 %v4384_v19 }
 0x3a3   :  { %1969 = vmatprep.subr.bf16.mxu0 %v4390_v0  ;;  %2010 = vmatprep.subr.bf16.mxu1 %v4392_v33 }
 0x3a6   :  { %1970 = vmatpush1.bf16.msra.mxu0 %v4394_v34  ;;  %2011 = vmatpush1.bf16.msra.mxu1 %v4396_v20 }
 0x3a7   :  { %1971 = vmatprep.subr.bf16.mxu0 %v4404_v24  ;;  %2012 = vmatprep.subr.bf16.mxu1 %v4408_v28 }
 0x3aa   :  { %1972 = vmatpush1.bf16.msra.mxu0 %v4402_v21  ;;  %2013 = vmatpush1.bf16.msra.mxu1 %v4406_v26 }
 0x3ab   :  { %1973 = vmatprep.subr.bf16.mxu0 %v4410_v27  ;;  %2014 = vmatprep.subr.bf16.mxu1 %v4413_v29 }
 0x3ae   :  { %1974 = vmatpush1.bf16.msra.mxu0 %v4417_v9  ;;  %2015 = vmatpush1.bf16.msra.mxu1 %v4421_v53 }
 0x3af   :  { %1975 = vmatprep.subr.bf16.mxu0 %v4423_v25  ;;  %2016 = vmatprep.subr.bf16.mxu1 %v4426_v11 }
 0x3b2   :  { %1976 = vmatpush1.bf16.msra.mxu0 %v4429_v35  ;;  %2017 = vmatpush1.bf16.msra.mxu1 %v4433_v10 }
 0x3b3   :  { %1977 = vmatprep.subr.bf16.mxu0 %v4435_v30  ;;  %2018 = vmatprep.subr.bf16.mxu1 %v4438_v13 }
 0x3b6   :  { %1978 = vmatpush1.bf16.msra.mxu0 %v4441_v6  ;;  %2019 = vmatpush1.bf16.msra.mxu1 %v4445_v36 }
 0x3b7   :  { %2277 = vmatprep.subr.bf16.mxu0 %v4354_v62  ;;  %2318 = vmatprep.subr.bf16.mxu1 %v4356_v7 }
 0x46b   :  { %v1683_v37 = vpop.f32.mrb[28].mxu0  ;;  %v1724_v38 = vpop.f32.mrb[28].mxu1 }
 0x46c   :  { %v1731_v40 = vadd.f32 %v1683_v37, %v4636_v39  ;;  %v1733_v42 = vadd.f32 %v1724_v38, %v4637_v41  ;;  %v1685_v43 = vpop.f32.mrb[29].mxu0  ;;  %v1726_v45 = vpop.f32.mrb[29].mxu1 }
 0x46d   :  { %v1732_v47 = vadd.f32 %v1685_v43, %v4638_v46  ;;  %v1734_v49 = vadd.f32 %v1726_v45, %v4639_v48  ;;  %v1687_v50 = vpop.f32.mrb[30].mxu0  ;;  %v1728_v51 = vpop.f32.mrb[30].mxu1  ;;  %v4640_v43 = vld [vmem:[#allocation23_spill] sm:$0xff]  ;;  %v4641_v46 = vld [vmem:[#allocation24_spill] sm:$0xff] }
 0x46e   :  { %v3329_v52 = vmul.f32 -1.442695, %v1731_v40  ;;  %v1688_v54 = vpop.f32.mrb[31].mxu0  ;;  %v1729_v55 = vpop.f32.mrb[31].mxu1  ;;  %v4642_v50 = vld [vmem:[#allocation25_spill] sm:$0xff] }
 0x46f   :  { %v3330_v56 = vmul.f32 -1.442695, %v1732_v47  ;;  %v3331_v57 = vmul.f32 -1.442695, %v1734_v49 }
 0x470   :  { %3727 = vpow2.f32 %v3329_v52  ;;  %v4643_v52 = vld [vmem:[#allocation26_spill] sm:$0xff] }
 0x471   :  { %3729 = vpow2.f32 %v3330_v56 }
 0x472   :  { %3731 = vpow2.f32 %v3331_v57 }
 0x473   :  { %3733 = vtanh.f32 %v1733_v42 }
 0x47a   :  { %v3728_v58 = vpop.eup %3727 }
 0x47b   :  { %v3730_v59 = vpop.eup %3729  ;;  %v1738_v60 = vadd.f32 1.0, %v3728_v58 }
 0x47c   :  { %v1744_v61 = vadd.f32 1.0, %v3730_v59  ;;  %v3732_v63 = vpop.eup %3731 }
 0x47d   :  { %3735 = vrcp.f32 %v1738_v60  ;;  %v3734_v1 = vpop.eup %3733  ;;  %v1751_v32 = vadd.f32 1.0, %v3732_v63 }
 0x47e   :  { %3737 = vrcp.f32 %v1744_v61 }
 0x47f   :  { %3739 = vrcp.f32 %v1751_v32 }
 0x487   :  { %v3736_v2 = vpop.eup %3735 }
 0x488   :  { %v3738_v4 = vpop.eup %3737  ;;  %v1756_v5 = vmul.f32 %v3736_v2, %v3734_v1 }
 0x489   :  { %v1755_v44 = vmul.f32 %v3738_v4, %v4349_v3  ;;  %v3740_v38 = vpop.eup %3739 }
 0x48b   :  { %v4457_v37 = vadd.f32 %v1756_v5, %v1755_v44 }
 0x48d   :  { %3741 = vtanh.f32 %v4457_v37 }
 0x497   :  { %v3742_v39 = vpop.eup %3741 }
 0x498   :  { %v1760_v40 = vmul.f32 %v3742_v39, %v3740_v38 }
 0x49a   :  { %v1770_v41 = vpack.c.bf16 %v1760_v40, %v1760_v40 }
 0x49c   :  { %1996 = vmatmul.mubr.bf16.vlgmr.msra.gmra.mrb[32].mxu0 %v1770_v41  ;;  %2037 = vmatmul.mubr.bf16.vlgmr.msra.gmra.mrb[32].mxu1 %v1770_v41 }
 0x49d   :  { %2278 = vmatpush1.bf16.msra.mxu0 %v4358_v8  ;;  %2319 = vmatpush1.bf16.msra.mxu1 %v4360_v12 }
 0x49e   :  { %2279 = vmatprep.subr.bf16.mxu0 %v4366_v23  ;;  %2320 = vmatprep.subr.bf16.mxu1 %v4368_v31 }
 0x49f   :  { %2309 = vmatprep.mubr.bf16.mxu0 %v4634_v22  ;;  %2350 = vmatprep.mubr.bf16.mxu1 %v4634_v22 }
 0x4a1   :  { %2280 = vmatpush1.bf16.msra.mxu0 %v4370_v15  ;;  %2321 = vmatpush1.bf16.msra.mxu1 %v4372_v14 }
 0x4a2   :  { %2281 = vmatprep.subr.bf16.mxu0 %v4378_v16  ;;  %2322 = vmatprep.subr.bf16.mxu1 %v4380_v18 }
 0x4a5   :  { %2282 = vmatpush1.bf16.msra.mxu0 %v4382_v17  ;;  %2323 = vmatpush1.bf16.msra.mxu1 %v4384_v19 }
 0x4a6   :  { %2283 = vmatprep.subr.bf16.mxu0 %v4390_v0  ;;  %2324 = vmatprep.subr.bf16.mxu1 %v4392_v33 }
 0x4a9   :  { %2284 = vmatpush1.bf16.msra.mxu0 %v4394_v34  ;;  %2325 = vmatpush1.bf16.msra.mxu1 %v4396_v20 }
 0x4aa   :  { %2285 = vmatprep.subr.bf16.mxu0 %v4404_v24  ;;  %2326 = vmatprep.subr.bf16.mxu1 %v4408_v28 }
 0x4ad   :  { %2286 = vmatpush1.bf16.msra.mxu0 %v4402_v21  ;;  %2327 = vmatpush1.bf16.msra.mxu1 %v4406_v26 }
 0x4ae   :  { %2287 = vmatprep.subr.bf16.mxu0 %v4410_v27  ;;  %2328 = vmatprep.subr.bf16.mxu1 %v4413_v29 }
 0x4b1   :  { %2288 = vmatpush1.bf16.msra.mxu0 %v4417_v9  ;;  %2329 = vmatpush1.bf16.msra.mxu1 %v4421_v53 }
 0x4b2   :  { %2289 = vmatprep.subr.bf16.mxu0 %v4423_v25  ;;  %2330 = vmatprep.subr.bf16.mxu1 %v4426_v11 }
 0x4b5   :  { %2290 = vmatpush1.bf16.msra.mxu0 %v4429_v35  ;;  %2331 = vmatpush1.bf16.msra.mxu1 %v4433_v10 }
 0x4b6   :  { %2291 = vmatprep.subr.bf16.mxu0 %v4435_v30  ;;  %2332 = vmatprep.subr.bf16.mxu1 %v4438_v13 }
 0x4b9   :  { %2292 = vmatpush1.bf16.msra.mxu0 %v4441_v6  ;;  %2333 = vmatpush1.bf16.msra.mxu1 %v4445_v36 }
 0x4ba   :  { %2591 = vmatprep.subr.bf16.mxu0 %v4354_v62  ;;  %2632 = vmatprep.subr.bf16.mxu1 %v4356_v7 }
 0x56f   :  { %v1997_v3 = vpop.f32.mrb[32].mxu0  ;;  %v2038_v42 = vpop.f32.mrb[32].mxu1 }
 0x570   :  { %v2045_v45 = vadd.f32 %v1997_v3, %v4640_v43  ;;  %v2047_v47 = vadd.f32 %v2038_v42, %v4641_v46  ;;  %v1999_v48 = vpop.f32.mrb[33].mxu0  ;;  %v2040_v49 = vpop.f32.mrb[33].mxu1 }
 0x571   :  { %v2046_v51 = vadd.f32 %v1999_v48, %v4642_v50  ;;  %v2048_v54 = vadd.f32 %v2040_v49, %v4643_v52  ;;  %v2001_v55 = vpop.f32.mrb[34].mxu0  ;;  %v2042_v56 = vpop.f32.mrb[34].mxu1  ;;  %v4644_v48 = vld [vmem:[#allocation27_spill] sm:$0xff]  ;;  %v4645_v50 = vld [vmem:[#allocation28_spill] sm:$0xff] }
 0x572   :  { %v3364_v57 = vmul.f32 -1.442695, %v2045_v45  ;;  %v2002_v58 = vpop.f32.mrb[35].mxu0  ;;  %v2043_v59 = vpop.f32.mrb[35].mxu1  ;;  %v4646_v55 = vld [vmem:[#allocation29_spill] sm:$0xff] }
 0x573   :  { %v3365_v60 = vmul.f32 -1.442695, %v2046_v51  ;;  %v3366_v61 = vmul.f32 -1.442695, %v2048_v54 }
 0x574   :  { %3743 = vpow2.f32 %v3364_v57  ;;  %v4647_v57 = vld [vmem:[#allocation30_spill] sm:$0xff] }
 0x575   :  { %3745 = vpow2.f32 %v3365_v60 }
 0x576   :  { %3747 = vpow2.f32 %v3366_v61 }
 0x577   :  { %3749 = vtanh.f32 %v2047_v47 }
 0x57e   :  { %v3744_v63 = vpop.eup %3743 }
 0x57f   :  { %v3746_v1 = vpop.eup %3745  ;;  %v2052_v2 = vadd.f32 1.0, %v3744_v63 }
 0x580   :  { %v2058_v4 = vadd.f32 1.0, %v3746_v1  ;;  %v3748_v5 = vpop.eup %3747 }
 0x581   :  { %3751 = vrcp.f32 %v2052_v2  ;;  %v3750_v32 = vpop.eup %3749  ;;  %v2065_v40 = vadd.f32 1.0, %v3748_v5 }
 0x582   :  { %3753 = vrcp.f32 %v2058_v4 }
 0x583   :  { %3755 = vrcp.f32 %v2065_v40 }
 0x58b   :  { %v3752_v44 = vpop.eup %3751 }
 0x58c   :  { %v3754_v38 = vpop.eup %3753  ;;  %v2070_v39 = vmul.f32 %v3752_v44, %v3750_v32 }
 0x58d   :  { %v2069_v41 = vmul.f32 %v3754_v38, %v4457_v37  ;;  %v3756_v42 = vpop.eup %3755 }
 0x58f   :  { %v4499_v3 = vadd.f32 %v2070_v39, %v2069_v41 }
 0x591   :  { %3757 = vtanh.f32 %v4499_v3 }
 0x59b   :  { %v3758_v43 = vpop.eup %3757 }
 0x59c   :  { %v2074_v45 = vmul.f32 %v3758_v43, %v3756_v42 }
 0x59e   :  { %v2084_v46 = vpack.c.bf16 %v2074_v45, %v2074_v45 }
 0x5a0   :  { %2310 = vmatmul.mubr.bf16.vlgmr.msra.gmra.mrb[36].mxu0 %v2084_v46  ;;  %2351 = vmatmul.mubr.bf16.vlgmr.msra.gmra.mrb[36].mxu1 %v2084_v46 }
 0x5a1   :  { %2592 = vmatpush1.bf16.msra.mxu0 %v4358_v8  ;;  %2633 = vmatpush1.bf16.msra.mxu1 %v4360_v12 }
 0x5a2   :  { %2593 = vmatprep.subr.bf16.mxu0 %v4366_v23  ;;  %2634 = vmatprep.subr.bf16.mxu1 %v4368_v31 }
 0x5a3   :  { %2623 = vmatprep.mubr.bf16.mxu0 %v4634_v22  ;;  %2664 = vmatprep.mubr.bf16.mxu1 %v4634_v22 }
 0x5a5   :  { %2594 = vmatpush1.bf16.msra.mxu0 %v4370_v15  ;;  %2635 = vmatpush1.bf16.msra.mxu1 %v4372_v14 }
 0x5a6   :  { %2595 = vmatprep.subr.bf16.mxu0 %v4378_v16  ;;  %2636 = vmatprep.subr.bf16.mxu1 %v4380_v18 }
 0x5a9   :  { %2596 = vmatpush1.bf16.msra.mxu0 %v4382_v17  ;;  %2637 = vmatpush1.bf16.msra.mxu1 %v4384_v19 }
 0x5aa   :  { %2597 = vmatprep.subr.bf16.mxu0 %v4390_v0  ;;  %2638 = vmatprep.subr.bf16.mxu1 %v4392_v33 }
 0x5ad   :  { %2598 = vmatpush1.bf16.msra.mxu0 %v4394_v34  ;;  %2639 = vmatpush1.bf16.msra.mxu1 %v4396_v20 }
 0x5ae   :  { %2599 = vmatprep.subr.bf16.mxu0 %v4404_v24  ;;  %2640 = vmatprep.subr.bf16.mxu1 %v4408_v28 }
 0x5b1   :  { %2600 = vmatpush1.bf16.msra.mxu0 %v4402_v21  ;;  %2641 = vmatpush1.bf16.msra.mxu1 %v4406_v26 }
 0x5b2   :  { %2601 = vmatprep.subr.bf16.mxu0 %v4410_v27  ;;  %2642 = vmatprep.subr.bf16.mxu1 %v4413_v29 }
 0x5b5   :  { %2602 = vmatpush1.bf16.msra.mxu0 %v4417_v9  ;;  %2643 = vmatpush1.bf16.msra.mxu1 %v4421_v53 }
 0x5b6   :  { %2603 = vmatprep.subr.bf16.mxu0 %v4423_v25  ;;  %2644 = vmatprep.subr.bf16.mxu1 %v4426_v11 }
 0x5b9   :  { %2604 = vmatpush1.bf16.msra.mxu0 %v4429_v35  ;;  %2645 = vmatpush1.bf16.msra.mxu1 %v4433_v10 }
 0x5ba   :  { %2605 = vmatprep.subr.bf16.mxu0 %v4435_v30  ;;  %2646 = vmatprep.subr.bf16.mxu1 %v4438_v13 }
 0x5bd   :  { %2606 = vmatpush1.bf16.msra.mxu0 %v4441_v6  ;;  %2647 = vmatpush1.bf16.msra.mxu1 %v4445_v36 }
 0x5be   :  { %2905 = vmatprep.subr.bf16.mxu0 %v4354_v62  ;;  %2946 = vmatprep.subr.bf16.mxu1 %v4356_v7 }
 0x673   :  { %v2311_v37 = vpop.f32.mrb[36].mxu0  ;;  %v2352_v47 = vpop.f32.mrb[36].mxu1 }
 0x674   :  { %v2359_v49 = vadd.f32 %v2311_v37, %v4644_v48  ;;  %v2361_v51 = vadd.f32 %v2352_v47, %v4645_v50  ;;  %v2313_v52 = vpop.f32.mrb[37].mxu0  ;;  %v2354_v54 = vpop.f32.mrb[37].mxu1 }
 0x675   :  { %v2360_v56 = vadd.f32 %v2313_v52, %v4646_v55  ;;  %v2362_v58 = vadd.f32 %v2354_v54, %v4647_v57  ;;  %v2315_v59 = vpop.f32.mrb[38].mxu0  ;;  %v2356_v60 = vpop.f32.mrb[38].mxu1  ;;  %v3671_v52 = vld [vmem:[#allocation11] sm:$0xff]   ;;  %v3935_v54 = vmov 0.0   ;;  %v3672_v55 = vld [vmem:[#allocation11 + $0x8] sm:$0xff]   ;;  %v3674_v57 = vld [vmem:[#allocation11 + $0x18] sm:$0xff]  }
 0x676   :  { %v3399_v61 = vmul.f32 -1.442695, %v2359_v49  ;;  %v2316_v63 = vpop.f32.mrb[39].mxu0  ;;  %v2357_v1 = vpop.f32.mrb[39].mxu1  ;;  %v3676_v59 = vld [vmem:[#allocation11 + $0x28] sm:$0xff]   ;;  %v3677_v60 = vld [vmem:[#allocation11 + $0x30] sm:$0xff]  }
 0x677   :  { %v3400_v62 = vmul.f32 -1.442695, %v2360_v56  ;;  %v3401_v7 = vmul.f32 -1.442695, %v2362_v58  ;;  %v3673_v56 = vld [vmem:[#allocation11 + $0x10] sm:$0xff]   ;;  %v3675_v58 = vld [vmem:[#allocation11 + $0x20] sm:$0xff]  }
 0x678   :  { %3759 = vpow2.f32 %v3399_v61  ;;  %v3678_v61 = vld [vmem:[#allocation11 + $0x38] sm:$0xff]  }
 0x679   :  { %3761 = vpow2.f32 %v3400_v62  ;;  %v4652_v62 = vld [vmem:[#allocation35_spill] sm:$0xff] }
 0x67a   :  { %3763 = vpow2.f32 %v3401_v7 }
 0x67b   :  { %3765 = vtanh.f32 %v2361_v51 }
 0x682   :  { %v3760_v2 = vpop.eup %3759 }
 0x683   :  { %v3762_v4 = vpop.eup %3761  ;;  %v2366_v5 = vadd.f32 1.0, %v3760_v2  ;;  %v4653_v2 = vld [vmem:[#allocation36_spill] sm:$0xff] }
 0x684   :  { %v2372_v32 = vadd.f32 1.0, %v3762_v4  ;;  %v3764_v44 = vpop.eup %3763 }
 0x685   :  { %3767 = vrcp.f32 %v2366_v5  ;;  %v3766_v38 = vpop.eup %3765  ;;  %v2379_v42 = vadd.f32 1.0, %v3764_v44  ;;  %v4654_v44 = vld [vmem:[#allocation37_spill] sm:$0xff] }
 0x686   :  { %3769 = vrcp.f32 %v2372_v32 }
 0x687   :  { %3771 = vrcp.f32 %v2379_v42 }
 0x68f   :  { %v3768_v39 = vpop.eup %3767 }
 0x690   :  { %v3770_v40 = vpop.eup %3769  ;;  %v2384_v41 = vmul.f32 %v3768_v39, %v3766_v38  ;;  %v4655_v39 = vld [vmem:[#allocation38_spill] sm:$0xff] }
 0x691   :  { %v2383_v43 = vmul.f32 %v3770_v40, %v4499_v3  ;;  %v3772_v46 = vpop.eup %3771 }
 0x693   :  { %v4541_v45 = vadd.f32 %v2384_v41, %v2383_v43 }
 0x695   :  { %3773 = vtanh.f32 %v4541_v45 }
 0x69f   :  { %v3774_v37 = vpop.eup %3773 }
 0x6a0   :  { %v2388_v47 = vmul.f32 %v3774_v37, %v3772_v46 }
 0x6a2   :  { %v2398_v48 = vpack.c.bf16 %v2388_v47, %v2388_v47 }
 0x6a4   :  { %2624 = vmatmul.mubr.bf16.vlgmr.msra.gmra.mrb[40].mxu0 %v2398_v48  ;;  %2665 = vmatmul.mubr.bf16.vlgmr.msra.gmra.mrb[40].mxu1 %v2398_v48 }
 0x6a5   :  { %2906 = vmatpush1.bf16.msra.mxu0 %v4358_v8  ;;  %2947 = vmatpush1.bf16.msra.mxu1 %v4360_v12  ;;  %v4648_v12 = vld [vmem:[#allocation31_spill] sm:$0xff] }
 0x6a6   :  { %2907 = vmatprep.subr.bf16.mxu0 %v4366_v23  ;;  %2948 = vmatprep.subr.bf16.mxu1 %v4368_v31  ;;  %v4649_v31 = vld [vmem:[#allocation32_spill] sm:$0xff] }
 0x6a7   :  { %2937 = vmatprep.mubr.bf16.mxu0 %v4634_v22  ;;  %2978 = vmatprep.mubr.bf16.mxu1 %v4634_v22 }
 0x6a9   :  { %2908 = vmatpush1.bf16.msra.mxu0 %v4370_v15  ;;  %2949 = vmatpush1.bf16.msra.mxu1 %v4372_v14 }
 0x6aa   :  { %2909 = vmatprep.subr.bf16.mxu0 %v4378_v16  ;;  %2950 = vmatprep.subr.bf16.mxu1 %v4380_v18  ;;  %v4650_v18 = vld [vmem:[#allocation33_spill] sm:$0xff] }
 0x6ad   :  { %2910 = vmatpush1.bf16.msra.mxu0 %v4382_v17  ;;  %2951 = vmatpush1.bf16.msra.mxu1 %v4384_v19  ;;  %v4651_v19 = vld [vmem:[#allocation34_spill] sm:$0xff] }
 0x6ae   :  { %2911 = vmatprep.subr.bf16.mxu0 %v4390_v0  ;;  %2952 = vmatprep.subr.bf16.mxu1 %v4392_v33 }
 0x6b1   :  { %2912 = vmatpush1.bf16.msra.mxu0 %v4394_v34  ;;  %2953 = vmatpush1.bf16.msra.mxu1 %v4396_v20 }
 0x6b2   :  { %2913 = vmatprep.subr.bf16.mxu0 %v4404_v24  ;;  %2954 = vmatprep.subr.bf16.mxu1 %v4408_v28 }
 0x6b5   :  { %2914 = vmatpush1.bf16.msra.mxu0 %v4402_v21  ;;  %2955 = vmatpush1.bf16.msra.mxu1 %v4406_v26 }
 0x6b6   :  { %2915 = vmatprep.subr.bf16.mxu0 %v4410_v27  ;;  %2956 = vmatprep.subr.bf16.mxu1 %v4413_v29 }
 0x6b9   :  { %2916 = vmatpush1.bf16.msra.mxu0 %v4417_v9  ;;  %2957 = vmatpush1.bf16.msra.mxu1 %v4421_v53 }
 0x6ba   :  { %2917 = vmatprep.subr.bf16.mxu0 %v4423_v25  ;;  %2958 = vmatprep.subr.bf16.mxu1 %v4426_v11 }
 0x6bd   :  { %2918 = vmatpush1.bf16.msra.mxu0 %v4429_v35  ;;  %2959 = vmatpush1.bf16.msra.mxu1 %v4433_v10 }
 0x6be   :  { %2919 = vmatprep.subr.bf16.mxu0 %v4435_v30  ;;  %2960 = vmatprep.subr.bf16.mxu1 %v4438_v13 }
 0x6c1   :  { %2920 = vmatpush1.bf16.msra.mxu0 %v4441_v6  ;;  %2961 = vmatpush1.bf16.msra.mxu1 %v4445_v36 }
 0x6c2   :  { %3490 = vmatprep.subr.bf16.mxu0 %v3935_v54 }
 0x777   :  { %v2625_v22 = vpop.f32.mrb[40].mxu0  ;;  %v2666_v8 = vpop.f32.mrb[40].mxu1 }
 0x778   :  { %v2673_v23 = vadd.f32 %v2625_v22, %v4648_v12  ;;  %v2675_v15 = vadd.f32 %v2666_v8, %v4649_v31  ;;  %v2627_v14 = vpop.f32.mrb[41].mxu0  ;;  %v2668_v16 = vpop.f32.mrb[41].mxu1 }
 0x779   :  { %v2674_v17 = vadd.f32 %v2627_v14, %v4650_v18  ;;  %v2676_v0 = vadd.f32 %v2668_v16, %v4651_v19  ;;  %v2629_v33 = vpop.f32.mrb[42].mxu0  ;;  %v2670_v34 = vpop.f32.mrb[42].mxu1 }
 0x77a   :  { %v3434_v20 = vmul.f32 -1.442695, %v2673_v23  ;;  %v2630_v21 = vpop.f32.mrb[43].mxu0  ;;  %v2671_v24 = vpop.f32.mrb[43].mxu1 }
 0x77b   :  { %v3435_v26 = vmul.f32 -1.442695, %v2674_v17  ;;  %v3436_v28 = vmul.f32 -1.442695, %v2676_v0  ;;  %v3472_v21 = vld [vmem:[%s4609_s5] ss:$0 sm:$0xff] }
 0x77c   :  { %3775 = vpow2.f32 %v3434_v20 }
 0x77d   :  { %3777 = vpow2.f32 %v3435_v26 }
 0x77e   :  { %3779 = vpow2.f32 %v3436_v28 }
 0x77f   :  { %3781 = vtanh.f32 %v2675_v15 }
 0x786   :  { %v3776_v27 = vpop.eup %3775 }
 0x787   :  { %v3778_v29 = vpop.eup %3777  ;;  %v2680_v9 = vadd.f32 1.0, %v3776_v27 }
 0x788   :  { %v2686_v53 = vadd.f32 1.0, %v3778_v29  ;;  %v3780_v25 = vpop.eup %3779 }
 0x789   :  { %3783 = vrcp.f32 %v2680_v9  ;;  %v3782_v11 = vpop.eup %3781  ;;  %v2693_v13 = vadd.f32 1.0, %v3780_v25 }
 0x78a   :  { %3785 = vrcp.f32 %v2686_v53 }
 0x78b   :  { %3787 = vrcp.f32 %v2693_v13 }
 0x793   :  { %v3784_v35 = vpop.eup %3783 }
 0x794   :  { %v3786_v10 = vpop.eup %3785  ;;  %v2698_v30 = vmul.f32 %v3784_v35, %v3782_v11 }
 0x795   :  { %v2697_v6 = vmul.f32 %v3786_v10, %v4541_v45  ;;  %v3788_v3 = vpop.eup %3787 }
 0x797   :  { %v4581_v36 = vadd.f32 %v2698_v30, %v2697_v6 }
 0x799   :  { %3789 = vtanh.f32 %v4581_v36 }
 0x7a3   :  { %v3790_v49 = vpop.eup %3789 }
 0x7a4   :  { %v2702_v50 = vmul.f32 %v3790_v49, %v3788_v3 }
 0x7a6   :  { %v2712_v51 = vpack.c.bf16 %v2702_v50, %v2702_v50 }
 0x7a8   :  { %2938 = vmatmul.mubr.bf16.vlgmr.msra.gmra.mrb[44].mxu0 %v2712_v51  ;;  %2979 = vmatmul.mubr.bf16.vlgmr.msra.gmra.mrb[44].mxu1 %v2712_v51 }
 0x7a9   :  { %3491 = vmatpush3.bf16.msra.mxu0 %v3671_v52  ;;  %3506 = vmatprep.mubr.msk.bf16.mxu0 %vm3936_vm0, %v3935_v54 }
 0x7aa   :  { %3492 = vmatprep.subr.bf16.mxu0 %v3935_v54 }
 0x7ad   :  { %3493 = vmatpush3.bf16.msra.mxu0 %v3672_v55 }
 0x7ae   :  { %3494 = vmatprep.subr.bf16.mxu0 %v3935_v54 }
 0x7b1   :  { %3495 = vmatpush3.bf16.msra.mxu0 %v3673_v56 }
 0x7b2   :  { %3496 = vmatprep.subr.bf16.mxu0 %v3935_v54 }
 0x7b5   :  { %3497 = vmatpush3.bf16.msra.mxu0 %v3674_v57 }
 0x7b6   :  { %3498 = vmatprep.subr.bf16.mxu0 %v3935_v54 }
 0x7b9   :  { %3499 = vmatpush3.bf16.msra.mxu0 %v3675_v58 }
 0x7ba   :  { %3500 = vmatprep.subr.bf16.mxu0 %v3935_v54 }
 0x7bd   :  { %3501 = vmatpush3.bf16.msra.mxu0 %v3676_v59 }
 0x7be   :  { %3502 = vmatprep.subr.bf16.mxu0 %v3935_v54 }
 0x7c1   :  { %3503 = vmatpush3.bf16.msra.mxu0 %v3677_v60 }
 0x7c2   :  { %3504 = vmatprep.subr.bf16.mxu0 %v3935_v54 }
 0x7c5   :  { %3505 = vmatpush3.bf16.msra.mxu0 %v3678_v61 }
 0x87b   :  { %v2939_v63 = vpop.f32.mrb[44].mxu0  ;;  %v2980_v1 = vpop.f32.mrb[44].mxu1 }
 0x87c   :  { %v2987_v7 = vadd.f32 %v2939_v63, %v4652_v62  ;;  %v2989_v4 = vadd.f32 %v2980_v1, %v4653_v2  ;;  %v2941_v5 = vpop.f32.mrb[45].mxu0  ;;  %v2982_v32 = vpop.f32.mrb[45].mxu1 }
 0x87d   :  { %v2988_v38 = vadd.f32 %v2941_v5, %v4654_v44  ;;  %v2990_v40 = vadd.f32 %v2982_v32, %v4655_v39  ;;  %v2943_v41 = vpop.f32.mrb[46].mxu0  ;;  %v2984_v42 = vpop.f32.mrb[46].mxu1 }
 0x87e   :  { %v3469_v43 = vmul.f32 -1.442695, %v2987_v7  ;;  %v2944_v45 = vpop.f32.mrb[47].mxu0  ;;  %v2985_v46 = vpop.f32.mrb[47].mxu1 }
 0x87f   :  { %v3470_v37 = vmul.f32 -1.442695, %v2988_v38  ;;  %v3471_v47 = vmul.f32 -1.442695, %v2990_v40 }
 0x880   :  { %3791 = vpow2.f32 %v3469_v43 }
 0x881   :  { %3793 = vpow2.f32 %v3470_v37 }
 0x882   :  { %3795 = vpow2.f32 %v3471_v47 }
 0x883   :  { %3797 = vtanh.f32 %v2989_v4 }
 0x88a   :  { %v3792_v48 = vpop.eup %3791 }
 0x88b   :  { %v3794_v22 = vpop.eup %3793  ;;  %v2994_v8 = vadd.f32 1.0, %v3792_v48 }
 0x88c   :  { %v3000_v12 = vadd.f32 1.0, %v3794_v22  ;;  %v3796_v23 = vpop.eup %3795 }
 0x88d   :  { %3799 = vrcp.f32 %v2994_v8  ;;  %v3798_v31 = vpop.eup %3797  ;;  %v3007_v18 = vadd.f32 1.0, %v3796_v23 }
 0x88e   :  { %3801 = vrcp.f32 %v3000_v12 }
 0x88f   :  { %3803 = vrcp.f32 %v3007_v18 }
 0x897   :  { %v3800_v15 = vpop.eup %3799 }
 0x898   :  { %v3802_v14 = vpop.eup %3801  ;;  %v3012_v16 = vmul.f32 %v3800_v15, %v3798_v31 }
 0x899   :  { %v3011_v17 = vmul.f32 %v3802_v14, %v4581_v36  ;;  %v3804_v0 = vpop.eup %3803 }
 0x89b   :  { %v3013_v19 = vadd.f32 %v3012_v16, %v3011_v17 }
 0x89d   :  { %3805 = vtanh.f32 %v3013_v19 }
 0x8a7   :  { %v3806_v33 = vpop.eup %3805 }
 0x8a8   :  { %v3016_v34 = vmul.f32 %v3806_v33, %v3804_v0 }
 0x8aa   :  { %v3019_v20 = vpack.c.bf16 %v3016_v34, %v3016_v34 }
 0x8ac   :  { %3507 = vmatmul.mubr.bf16.vlgmr.msra.gmra.mrb[48].mxu0 %v3019_v20 }
 0x97f   :  { %v3125_v24 = vpop.f32.mrb[48].mxu0 }
 0x980   :  { %v3126_v26 = vadd.f32 %v3472_v21, %v3125_v24  ;;  %v3508_v28 = vpop.f32.mrb[49].mxu0 }
 0x981   :  { %v3128_v27 = vpop.f32.mrb[50].mxu0 }
 0x982   :  { %3131 = vst [vmem:[#allocation13] sm:$0xff] %v3126_v26  ;;  %v3509_v29 = vpop.f32.mrb[51].mxu0 }
 0x983   :  { %3906 = shalt.err (!%p3903_p8)
}
 0x984   :  { %s3907_s5 = scalar_lea.hbm %s4610_s6, 128 }
 0x985   :  { %p3908_p9 = scmp.ne.s32.totalorder %s4610_s6, %s3907_s5  ;;  %p3911_p10 = scmp.lt.u32.totalorder %s3907_s5, %s4610_s6 }
 0x987   :  { %p3913_p11 = pnand %p3911_p10, %p3908_p9 }
 0x989   :  { %3916 = shalt.err (!%p3913_p11)
}
 0x98a   :  { %3141 = dma.vmem_to_hbm [thread:$0]  %s3139_s24, 128, %s4610_s6, [#allocation7]  }
 0x98b   :  { %3923 = dma.done.wait [#allocation7], 128  }
 0x98c   :  { %3924 = vsyncadd [#allocation7], 4294967168 }
 0x98d   :  { %3145 = vsyncpa [#allocation6], 1 }
 0x98e   :  { %3146 = vsyncpa [#allocation9], 1 }
 0x98f   :  { %3147 = vsyncpa [#allocation12], 1 }
 0x990   :  { %3148 = vsyncpa [#allocation7], 1 }

</bundles_post_ra>
